<compile_context>
chip_gen: v5e
topology: v5e:2x2
jax: 0.10.0
libtpu: 0.0.40
codegen_flags: <defaults>
</compile_context>

<pallas_src>
import jax
import jax.numpy as jnp
from jax.experimental import pallas as pl
from jax.experimental.pallas import tpu as pltpu


EMBEDDING_DIM = 64
NUM_CODES = 64                    # "num_classes" argument of the module
NUM_CLASSES = NUM_CODES + 1       # module adds 1 (BOS token)

HP = 128                          # padded hidden dim (lane-aligned)
CP = 128                          # padded class dim (lane-aligned)
GP = 4 * HP                       # padded fused-gate width


def _lstm_kernel(gx_ref, whh_ref, wfc_ref, bfc_ref, out_ref, hist_ref):
    """Whole-sequence LSTM recurrence + output projection, resident in VMEM.

    gx_ref  : (T, Bp, 4Hp) f32   precomputed input-side gate pre-activations
    whh_ref : (Hp, 4Hp)    bf16  recurrent weights (gate order i, f, o, g)
    wfc_ref : (Hp, Cp)     bf16
    bfc_ref : (1, Cp)      f32
    out_ref : (T, Bp, Cp)  f32   logits (padded, lane-dense stores)
    hist_ref: (T, Bp, Hp)  bf16  scratch: per-step hidden states
    """
    T, Bp, _ = gx_ref.shape
    Hp = whh_ref.shape[0]
    Cp = out_ref.shape[2]

    # ---- Serial recurrence: only h @ W_hh on the critical path; h and c -----
    # ---- live in the loop carry (vregs), never round-trip through VMEM. -----
    # TODO(synk): hold W_hh stationary in the MXU across the loop
    # (pltpu.matmul_push_rhs / matmul_acc_lhs / matmul_pop) to drop the
    # per-step RHS push; kept as jnp.dot for portability.
    def step(t, carry):
        h, c = carry
        gates = gx_ref[t] + jnp.dot(h.astype(jnp.bfloat16), whh_ref[...],
                                    preferred_element_type=jnp.float32)
        # Packed gate order (i, f, o, g): one contiguous sigmoid slab + tanh.
        sig = jax.nn.sigmoid(gates[:, :3 * Hp])
        i_g = sig[:, 0 * Hp:1 * Hp]
        f_g = sig[:, 1 * Hp:2 * Hp]
        o_g = sig[:, 2 * Hp:3 * Hp]
        g_g = jnp.tanh(gates[:, 3 * Hp:4 * Hp])
        c_new = f_g * c + i_g * g_g
        h_new = o_g * jnp.tanh(c_new)
        hist_ref[t] = h_new.astype(jnp.bfloat16)
        return (h_new, c_new)

    h0 = jnp.zeros((Bp, Hp), jnp.float32)
    c0 = jnp.zeros((Bp, Hp), jnp.float32)
    jax.lax.fori_loop(0, T, step, (h0, c0), unroll=min(T, 8))

    # ---- Deferred FC projection: one big lane-dense matmul + store. ---------
    h_all = hist_ref[...].reshape(T * Bp, Hp)                     # bf16
    logits = jnp.dot(h_all, wfc_ref[...], preferred_element_type=jnp.float32)
    out_ref[...] = (logits + bfc_ref[...]).reshape(T, Bp, Cp)


@jax.jit
def lstm_model_forward(tokens, kp):
    """Forward pass equivalent to LSTMModel.forward.

    tokens : int32 (B, T) with values in [0, NUM_CLASSES)
    kp     : packed/padded kernel parameters (see pack_params)
    returns: float32 (B, T, NUM_CLASSES) logits
    """
    e_gate = kp["e_gate"]                            # (NUM_CLASSES, 4Hp) f32
    Gp = e_gate.shape[1]

    B, T = tokens.shape
    Bp = max(16, ((B + 15) // 16) * 16)              # 16 sublanes (bf16 packing)

    # Fused embedding + input projection: gx = E_gate[token] (row gather).
    gx = e_gate[tokens]                              # (B, T, 4Hp) f32
    gx = jnp.pad(gx, ((0, Bp - B), (0, 0), (0, 0)))  # zero rows -> state stays 0
    gx_tm = jnp.transpose(gx, (1, 0, 2))             # (T, Bp, 4Hp) time-major

    # TODO(synk): for long sequences, chunk T via a grid axis ("arbitrary",
    # h/c carried in scratch) to respect v7x's 64 MiB VMEM; and at larger B,
    # add a leading "parallel" batch-block axis to shard across v7x's 2 TCs.
    logits_tm = pl.pallas_call(
        _lstm_kernel,
        out_shape=jax.ShapeDtypeStruct((T, Bp, CP), jnp.float32),
        in_specs=[
            pl.BlockSpec(memory_space=pltpu.MemorySpace.VMEM),   # gx
            pl.BlockSpec(memory_space=pltpu.MemorySpace.VMEM),   # W_hh^T
            pl.BlockSpec(memory_space=pltpu.MemorySpace.VMEM),   # W_fc^T
            pl.BlockSpec(memory_space=pltpu.MemorySpace.VMEM),   # b_fc
        ],
        out_specs=pl.BlockSpec(memory_space=pltpu.MemorySpace.VMEM),
        scratch_shapes=[
            pltpu.VMEM((T, Bp, HP), jnp.bfloat16),               # h history
        ],
        compiler_params=pltpu.CompilerParams(
            vmem_limit_bytes=32 * 1024 * 1024,   # above v5e's 16 MiB default,
        ),                                       # within every chip's physical
    )(gx_tm, kp["w_hh_t"], kp["w_fc_t"], kp["b_fc"])

    logits = jnp.transpose(logits_tm, (1, 0, 2))     # (Bp, T, Cp) batch_first
    return logits[:B, :, :NUM_CLASSES]


def init_params(key, hidden=EMBEDDING_DIM, num_classes=NUM_CLASSES):
    """Deterministic synthetic parameters in PyTorch layouts."""
    ks = jax.random.split(key, 7)
    H, C = hidden, num_classes
    scale = 1.0 / jnp.sqrt(H)
    # nn.Embedding(num_classes, H): weight (C, H)
    embedding = jax.random.normal(ks[0], (C, H), jnp.float32)
    # nn.LSTM(H, H): weight_ih_l0 (4H, H), weight_hh_l0 (4H, H), biases (4H,)
    w_ih = jax.random.uniform(ks[1], (4 * H, H), jnp.float32, -scale, scale)
    w_hh = jax.random.uniform(ks[2], (4 * H, H), jnp.float32, -scale, scale)
    b_ih = jax.random.uniform(ks[3], (4 * H,), jnp.float32, -scale, scale)
    b_hh = jax.random.uniform(ks[4], (4 * H,), jnp.float32, -scale, scale)
    # nn.Linear(H, C): weight (C, H), bias (C,)
    w_fc = jax.random.uniform(ks[5], (C, H), jnp.float32, -scale, scale)
    b_fc = jax.random.uniform(ks[6], (C,), jnp.float32, -scale, scale)
    return {"embedding": embedding, "w_ih": w_ih, "w_hh": w_hh,
            "b_ih": b_ih, "b_hh": b_hh, "w_fc": w_fc, "b_fc": b_fc}


def pack_params(raw, hidden=EMBEDDING_DIM, num_classes=NUM_CLASSES):
    """Fuse, transpose, reorder and zero-pad PyTorch-layout params.

    * E_gate = embedding @ W_ih^T + (b_ih + b_hh): the embedding lookup and the
      non-recurrent input projection collapse into a single gate table.
    * Gates are reordered from PyTorch (i, f, g, o) to packed (i, f, o, g) and
      each per-gate block is padded H(=64) -> Hp(=128) so gate boundaries land
      on 128-lane vreg boundaries. Padded lanes are exactly zero, so padded
      c/h lanes stay zero throughout the recurrence.
    """
    H, C = hidden, num_classes
    b = raw["b_ih"] + raw["b_hh"]                               # (4H,)
    e_gate = raw["embedding"] @ raw["w_ih"].T + b[None, :]      # (C, 4H) f32
    w_hh_t = raw["w_hh"].T                                      # (H, 4H)

    perm = (0, 1, 3, 2)          # packed slot k <- PyTorch gate perm[k]
    e_gate_p = jnp.zeros((C, GP), jnp.float32)
    w_hh_p = jnp.zeros((HP, GP), jnp.float32)
    for k, g in enumerate(perm):
        e_gate_p = e_gate_p.at[:, k * HP:k * HP + H].set(e_gate[:, g * H:(g + 1) * H])
        w_hh_p = w_hh_p.at[:H, k * HP:k * HP + H].set(w_hh_t[:, g * H:(g + 1) * H])

    w_fc_p = jnp.zeros((HP, CP), jnp.float32).at[:H, :C].set(raw["w_fc"].T)
    b_fc_p = jnp.zeros((1, CP), jnp.float32).at[0, :C].set(raw["b_fc"])

    return {
        "e_gate": e_gate_p,                          # (C, 4Hp)  f32
        "w_hh_t": w_hh_p.astype(jnp.bfloat16),       # (Hp, 4Hp) bf16
        "w_fc_t": w_fc_p.astype(jnp.bfloat16),       # (Hp, Cp)  bf16
        "b_fc": b_fc_p,                              # (1, Cp)   f32
    }


def _reference_forward(tokens, raw):
    """Pure-JAX f32 reference (same math as PyTorch, lax.scan over time)."""
    emb = raw["embedding"][tokens]                   # (B, T, H)
    B, _, H = emb.shape
    w_ih_t, w_hh_t = raw["w_ih"].T, raw["w_hh"].T
    b = (raw["b_ih"] + raw["b_hh"])[None, :]
    w_fc_t, b_fc = raw["w_fc"].T, raw["b_fc"][None, :]

    def step(carry, x_t):
        h, c = carry
        gates = x_t @ w_ih_t + h @ w_hh_t + b
        i_g = jax.nn.sigmoid(gates[:, 0 * H:1 * H])
        f_g = jax.nn.sigmoid(gates[:, 1 * H:2 * H])
        g_g = jnp.tanh(gates[:, 2 * H:3 * H])
        o_g = jax.nn.sigmoid(gates[:, 3 * H:4 * H])
        c_new = f_g * c + i_g * g_g
        h_new = o_g * jnp.tanh(c_new)
        return (h_new, c_new), h_new @ w_fc_t + b_fc

    h0 = jnp.zeros((B, H), jnp.float32)
    c0 = jnp.zeros((B, H), jnp.float32)
    _, logits_tm = jax.lax.scan(step, (h0, c0), jnp.transpose(emb, (1, 0, 2)))
    return jnp.transpose(logits_tm, (1, 0, 2))


if __name__ == "__main__":
    key = jax.random.PRNGKey(0)
    pkey, tkey = jax.random.split(key)

    raw_params = init_params(pkey)
    kernel_params = pack_params(raw_params)

    # Small example consistent with the module: batch=2, seq=input_len=4,
    # integer tokens in [0, NUM_CLASSES).
    B, T = 2, 4
    tokens = jax.random.randint(tkey, (B, T), 0, NUM_CLASSES, dtype=jnp.int32)

    logits = lstm_model_forward(tokens, kernel_params)
    logits = jax.block_until_ready(logits)

    assert logits.shape == (B, T, NUM_CLASSES), logits.shape

    ref = jax.block_until_ready(_reference_forward(tokens, raw_params))
    # Kernel uses bf16 matmul operands (f32 accumulation) on the recurrent and
    # FC paths; compare against the f32 reference with a bf16 tolerance.
    max_err = float(jnp.max(jnp.abs(logits - ref)))
    assert max_err < 5e-2, max_err

    print("KERNEL_OK")
</pallas_src>

<mosaic_0001>
module attributes {stable_mosaic.version = 11 : i64} {
  func.func @_lstm_kernel(%arg0: memref<4x16x512xf32, #tpu.memory_space<vmem>>, %arg1: memref<128x512xbf16, #tpu.memory_space<vmem>>, %arg2: memref<128x128xbf16, #tpu.memory_space<vmem>>, %arg3: memref<1x128xf32, #tpu.memory_space<vmem>>, %arg4: memref<4x16x128xf32, #tpu.memory_space<vmem>>, %arg5: memref<4x16x128xbf16, #tpu.memory_space<vmem>>) attributes {dimension_semantics = [], scalar_prefetch = 0 : i64, scratch_operands = 1 : i64, tpu.core_type = #tpu.core_type<tc>} {
    %cst = arith.constant 0.000000e+00 : f32
    %0 = vector.broadcast %cst : f32 to vector<16x128xf32>
    %cst_0 = arith.constant 0.000000e+00 : f32
    %1 = vector.broadcast %cst_0 : f32 to vector<16x128xf32>
    %c0_i32 = arith.constant 0 : i32
    %2 = arith.index_cast %c0_i32 : i32 to index
    %c0 = arith.constant 0 : index
    %c0_1 = arith.constant 0 : index
    %3 = vector.load %arg0[%2, %c0, %c0_1] : memref<4x16x512xf32, #tpu.memory_space<vmem>>, vector<1x16x512xf32>
    %4 = vector.shape_cast %3 : vector<1x16x512xf32> to vector<16x512xf32>
    %5 = arith.truncf %0 : vector<16x128xf32> to vector<16x128xbf16>
    %c0_2 = arith.constant 0 : index
    %c0_3 = arith.constant 0 : index
    %6 = vector.load %arg1[%c0_2, %c0_3] : memref<128x512xbf16, #tpu.memory_space<vmem>>, vector<128x512xbf16>
    %cst_4 = arith.constant dense<0.000000e+00> : vector<16x512xf32>
    %7 = tpu.matmul %5, %6, %cst_4 {dimension_numbers = #tpu.dot_dimension_numbers<[1], [0], [0], [1], [0, 0, 1, 1], [], []>} : vector<16x128xbf16>, vector<128x512xbf16>, vector<16x512xf32> -> vector<16x512xf32>
    %8 = arith.addf %4, %7 : vector<16x512xf32>
    %9 = vector.extract_strided_slice %8 {offsets = [0, 0], sizes = [16, 384], strides = [1, 1]} : vector<16x512xf32> to vector<16x384xf32>
    %10 = arith.negf %9 : vector<16x384xf32>
    %11 = math.exp %10 : vector<16x384xf32>
    %cst_5 = arith.constant 1.000000e+00 : f32
    %12 = vector.broadcast %cst_5 : f32 to vector<16x384xf32>
    %13 = arith.addf %12, %11 : vector<16x384xf32>
    %14 = arith.divf %12, %13 : vector<16x384xf32>
    %15 = vector.extract_strided_slice %14 {offsets = [0, 0], sizes = [16, 128], strides = [1, 1]} : vector<16x384xf32> to vector<16x128xf32>
    %16 = vector.extract_strided_slice %14 {offsets = [0, 128], sizes = [16, 128], strides = [1, 1]} : vector<16x384xf32> to vector<16x128xf32>
    %17 = vector.extract_strided_slice %14 {offsets = [0, 256], sizes = [16, 128], strides = [1, 1]} : vector<16x384xf32> to vector<16x128xf32>
    %18 = vector.extract_strided_slice %8 {offsets = [0, 384], sizes = [16, 128], strides = [1, 1]} : vector<16x512xf32> to vector<16x128xf32>
    %19 = math.tanh %18 : vector<16x128xf32>
    %20 = arith.mulf %16, %1 : vector<16x128xf32>
    %21 = arith.mulf %15, %19 : vector<16x128xf32>
    %22 = arith.addf %20, %21 : vector<16x128xf32>
    %23 = math.tanh %22 : vector<16x128xf32>
    %24 = arith.mulf %17, %23 : vector<16x128xf32>
    %25 = arith.truncf %24 : vector<16x128xf32> to vector<16x128xbf16>
    %26 = arith.index_cast %c0_i32 : i32 to index
    %c0_6 = arith.constant 0 : index
    %c0_7 = arith.constant 0 : index
    %27 = vector.load %arg5[%26, %c0_6, %c0_7] : memref<4x16x128xbf16, #tpu.memory_space<vmem>>, vector<1x16x128xbf16>
    %28 = vector.shape_cast %27 : vector<1x16x128xbf16> to vector<16x128xbf16>
    %29 = vector.shape_cast %25 : vector<16x128xbf16> to vector<1x16x128xbf16>
    tpu.vector_store %arg5[%26, %c0_6, %c0_7], %29 {strides = array<i32>} : memref<4x16x128xbf16, #tpu.memory_space<vmem>>, vector<1x16x128xbf16>,
    %c1_i32 = arith.constant 1 : i32
    %30 = arith.index_cast %c1_i32 : i32 to index
    %c0_8 = arith.constant 0 : index
    %c0_9 = arith.constant 0 : index
    %31 = vector.load %arg0[%30, %c0_8, %c0_9] : memref<4x16x512xf32, #tpu.memory_space<vmem>>, vector<1x16x512xf32>
    %32 = vector.shape_cast %31 : vector<1x16x512xf32> to vector<16x512xf32>
    %33 = arith.truncf %24 : vector<16x128xf32> to vector<16x128xbf16>
    %c0_10 = arith.constant 0 : index
    %c0_11 = arith.constant 0 : index
    %34 = vector.load %arg1[%c0_10, %c0_11] : memref<128x512xbf16, #tpu.memory_space<vmem>>, vector<128x512xbf16>
    %cst_12 = arith.constant dense<0.000000e+00> : vector<16x512xf32>
    %35 = tpu.matmul %33, %34, %cst_12 {dimension_numbers = #tpu.dot_dimension_numbers<[1], [0], [0], [1], [0, 0, 1, 1], [], []>} : vector<16x128xbf16>, vector<128x512xbf16>, vector<16x512xf32> -> vector<16x512xf32>
    %36 = arith.addf %32, %35 : vector<16x512xf32>
    %37 = vector.extract_strided_slice %36 {offsets = [0, 0], sizes = [16, 384], strides = [1, 1]} : vector<16x512xf32> to vector<16x384xf32>
    %38 = arith.negf %37 : vector<16x384xf32>
    %39 = math.exp %38 : vector<16x384xf32>
    %cst_13 = arith.constant 1.000000e+00 : f32
    %40 = vector.broadcast %cst_13 : f32 to vector<16x384xf32>
    %41 = arith.addf %40, %39 : vector<16x384xf32>
    %42 = arith.divf %40, %41 : vector<16x384xf32>
    %43 = vector.extract_strided_slice %42 {offsets = [0, 0], sizes = [16, 128], strides = [1, 1]} : vector<16x384xf32> to vector<16x128xf32>
    %44 = vector.extract_strided_slice %42 {offsets = [0, 128], sizes = [16, 128], strides = [1, 1]} : vector<16x384xf32> to vector<16x128xf32>
    %45 = vector.extract_strided_slice %42 {offsets = [0, 256], sizes = [16, 128], strides = [1, 1]} : vector<16x384xf32> to vector<16x128xf32>
    %46 = vector.extract_strided_slice %36 {offsets = [0, 384], sizes = [16, 128], strides = [1, 1]} : vector<16x512xf32> to vector<16x128xf32>
    %47 = math.tanh %46 : vector<16x128xf32>
    %48 = arith.mulf %44, %22 : vector<16x128xf32>
    %49 = arith.mulf %43, %47 : vector<16x128xf32>
    %50 = arith.addf %48, %49 : vector<16x128xf32>
    %51 = math.tanh %50 : vector<16x128xf32>
    %52 = arith.mulf %45, %51 : vector<16x128xf32>
    %53 = arith.truncf %52 : vector<16x128xf32> to vector<16x128xbf16>
    %54 = arith.index_cast %c1_i32 : i32 to index
    %c0_14 = arith.constant 0 : index
    %c0_15 = arith.constant 0 : index
    %55 = vector.load %arg5[%54, %c0_14, %c0_15] : memref<4x16x128xbf16, #tpu.memory_space<vmem>>, vector<1x16x128xbf16>
    %56 = vector.shape_cast %55 : vector<1x16x128xbf16> to vector<16x128xbf16>
    %57 = vector.shape_cast %53 : vector<16x128xbf16> to vector<1x16x128xbf16>
    tpu.vector_store %arg5[%54, %c0_14, %c0_15], %57 {strides = array<i32>} : memref<4x16x128xbf16, #tpu.memory_space<vmem>>, vector<1x16x128xbf16>,
    %c2_i32 = arith.constant 2 : i32
    %58 = arith.index_cast %c2_i32 : i32 to index
    %c0_16 = arith.constant 0 : index
    %c0_17 = arith.constant 0 : index
    %59 = vector.load %arg0[%58, %c0_16, %c0_17] : memref<4x16x512xf32, #tpu.memory_space<vmem>>, vector<1x16x512xf32>
    %60 = vector.shape_cast %59 : vector<1x16x512xf32> to vector<16x512xf32>
    %61 = arith.truncf %52 : vector<16x128xf32> to vector<16x128xbf16>
    %c0_18 = arith.constant 0 : index
    %c0_19 = arith.constant 0 : index
    %62 = vector.load %arg1[%c0_18, %c0_19] : memref<128x512xbf16, #tpu.memory_space<vmem>>, vector<128x512xbf16>
    %cst_20 = arith.constant dense<0.000000e+00> : vector<16x512xf32>
    %63 = tpu.matmul %61, %62, %cst_20 {dimension_numbers = #tpu.dot_dimension_numbers<[1], [0], [0], [1], [0, 0, 1, 1], [], []>} : vector<16x128xbf16>, vector<128x512xbf16>, vector<16x512xf32> -> vector<16x512xf32>
    %64 = arith.addf %60, %63 : vector<16x512xf32>
    %65 = vector.extract_strided_slice %64 {offsets = [0, 0], sizes = [16, 384], strides = [1, 1]} : vector<16x512xf32> to vector<16x384xf32>
    %66 = arith.negf %65 : vector<16x384xf32>
    %67 = math.exp %66 : vector<16x384xf32>
    %cst_21 = arith.constant 1.000000e+00 : f32
    %68 = vector.broadcast %cst_21 : f32 to vector<16x384xf32>
    %69 = arith.addf %68, %67 : vector<16x384xf32>
    %70 = arith.divf %68, %69 : vector<16x384xf32>
    %71 = vector.extract_strided_slice %70 {offsets = [0, 0], sizes = [16, 128], strides = [1, 1]} : vector<16x384xf32> to vector<16x128xf32>
    %72 = vector.extract_strided_slice %70 {offsets = [0, 128], sizes = [16, 128], strides = [1, 1]} : vector<16x384xf32> to vector<16x128xf32>
    %73 = vector.extract_strided_slice %70 {offsets = [0, 256], sizes = [16, 128], strides = [1, 1]} : vector<16x384xf32> to vector<16x128xf32>
    %74 = vector.extract_strided_slice %64 {offsets = [0, 384], sizes = [16, 128], strides = [1, 1]} : vector<16x512xf32> to vector<16x128xf32>
    %75 = math.tanh %74 : vector<16x128xf32>
    %76 = arith.mulf %72, %50 : vector<16x128xf32>
    %77 = arith.mulf %71, %75 : vector<16x128xf32>
    %78 = arith.addf %76, %77 : vector<16x128xf32>
    %79 = math.tanh %78 : vector<16x128xf32>
    %80 = arith.mulf %73, %79 : vector<16x128xf32>
    %81 = arith.truncf %80 : vector<16x128xf32> to vector<16x128xbf16>
    %82 = arith.index_cast %c2_i32 : i32 to index
    %c0_22 = arith.constant 0 : index
    %c0_23 = arith.constant 0 : index
    %83 = vector.load %arg5[%82, %c0_22, %c0_23] : memref<4x16x128xbf16, #tpu.memory_space<vmem>>, vector<1x16x128xbf16>
    %84 = vector.shape_cast %83 : vector<1x16x128xbf16> to vector<16x128xbf16>
    %85 = vector.shape_cast %81 : vector<16x128xbf16> to vector<1x16x128xbf16>
    tpu.vector_store %arg5[%82, %c0_22, %c0_23], %85 {strides = array<i32>} : memref<4x16x128xbf16, #tpu.memory_space<vmem>>, vector<1x16x128xbf16>,
    %c3_i32 = arith.constant 3 : i32
    %86 = arith.index_cast %c3_i32 : i32 to index
    %c0_24 = arith.constant 0 : index
    %c0_25 = arith.constant 0 : index
    %87 = vector.load %arg0[%86, %c0_24, %c0_25] : memref<4x16x512xf32, #tpu.memory_space<vmem>>, vector<1x16x512xf32>
    %88 = vector.shape_cast %87 : vector<1x16x512xf32> to vector<16x512xf32>
    %89 = arith.truncf %80 : vector<16x128xf32> to vector<16x128xbf16>
    %c0_26 = arith.constant 0 : index
    %c0_27 = arith.constant 0 : index
    %90 = vector.load %arg1[%c0_26, %c0_27] : memref<128x512xbf16, #tpu.memory_space<vmem>>, vector<128x512xbf16>
    %cst_28 = arith.constant dense<0.000000e+00> : vector<16x512xf32>
    %91 = tpu.matmul %89, %90, %cst_28 {dimension_numbers = #tpu.dot_dimension_numbers<[1], [0], [0], [1], [0, 0, 1, 1], [], []>} : vector<16x128xbf16>, vector<128x512xbf16>, vector<16x512xf32> -> vector<16x512xf32>
    %92 = arith.addf %88, %91 : vector<16x512xf32>
    %93 = vector.extract_strided_slice %92 {offsets = [0, 0], sizes = [16, 384], strides = [1, 1]} : vector<16x512xf32> to vector<16x384xf32>
    %94 = arith.negf %93 : vector<16x384xf32>
    %95 = math.exp %94 : vector<16x384xf32>
    %cst_29 = arith.constant 1.000000e+00 : f32
    %96 = vector.broadcast %cst_29 : f32 to vector<16x384xf32>
    %97 = arith.addf %96, %95 : vector<16x384xf32>
    %98 = arith.divf %96, %97 : vector<16x384xf32>
    %99 = vector.extract_strided_slice %98 {offsets = [0, 0], sizes = [16, 128], strides = [1, 1]} : vector<16x384xf32> to vector<16x128xf32>
    %100 = vector.extract_strided_slice %98 {offsets = [0, 128], sizes = [16, 128], strides = [1, 1]} : vector<16x384xf32> to vector<16x128xf32>
    %101 = vector.extract_strided_slice %98 {offsets = [0, 256], sizes = [16, 128], strides = [1, 1]} : vector<16x384xf32> to vector<16x128xf32>
    %102 = vector.extract_strided_slice %92 {offsets = [0, 384], sizes = [16, 128], strides = [1, 1]} : vector<16x512xf32> to vector<16x128xf32>
    %103 = math.tanh %102 : vector<16x128xf32>
    %104 = arith.mulf %100, %78 : vector<16x128xf32>
    %105 = arith.mulf %99, %103 : vector<16x128xf32>
    %106 = arith.addf %104, %105 : vector<16x128xf32>
    %107 = math.tanh %106 : vector<16x128xf32>
    %108 = arith.mulf %101, %107 : vector<16x128xf32>
    %109 = arith.truncf %108 : vector<16x128xf32> to vector<16x128xbf16>
    %110 = arith.index_cast %c3_i32 : i32 to index
    %c0_30 = arith.constant 0 : index
    %c0_31 = arith.constant 0 : index
    %111 = vector.load %arg5[%110, %c0_30, %c0_31] : memref<4x16x128xbf16, #tpu.memory_space<vmem>>, vector<1x16x128xbf16>
    %112 = vector.shape_cast %111 : vector<1x16x128xbf16> to vector<16x128xbf16>
    %113 = vector.shape_cast %109 : vector<16x128xbf16> to vector<1x16x128xbf16>
    tpu.vector_store %arg5[%110, %c0_30, %c0_31], %113 {strides = array<i32>} : memref<4x16x128xbf16, #tpu.memory_space<vmem>>, vector<1x16x128xbf16>,
    %c4_i32 = arith.constant 4 : i32
    %c0_32 = arith.constant 0 : index
    %c0_33 = arith.constant 0 : index
    %c0_34 = arith.constant 0 : index
    %114 = vector.load %arg5[%c0_32, %c0_33, %c0_34] : memref<4x16x128xbf16, #tpu.memory_space<vmem>>, vector<4x16x128xbf16>
    %115 = vector.shape_cast %114 : vector<4x16x128xbf16> to vector<64x128xbf16>
    %c0_35 = arith.constant 0 : index
    %c0_36 = arith.constant 0 : index
    %116 = vector.load %arg2[%c0_35, %c0_36] : memref<128x128xbf16, #tpu.memory_space<vmem>>, vector<128x128xbf16>
    %cst_37 = arith.constant dense<0.000000e+00> : vector<64x128xf32>
    %117 = tpu.matmul %115, %116, %cst_37 {dimension_numbers = #tpu.dot_dimension_numbers<[1], [0], [0], [1], [0, 0, 1, 1], [], []>} : vector<64x128xbf16>, vector<128x128xbf16>, vector<64x128xf32> -> vector<64x128xf32>
    %c0_38 = arith.constant 0 : index
    %c0_39 = arith.constant 0 : index
    %118 = vector.load %arg3[%c0_38, %c0_39] : memref<1x128xf32, #tpu.memory_space<vmem>>, vector<1x128xf32>
    %119 = vector.broadcast %118 : vector<1x128xf32> to vector<64x128xf32>
    %120 = arith.addf %117, %119 : vector<64x128xf32>
    %121 = vector.shape_cast %120 : vector<64x128xf32> to vector<4x16x128xf32>
    %c0_40 = arith.constant 0 : index
    %c0_41 = arith.constant 0 : index
    %c0_42 = arith.constant 0 : index
    %122 = vector.load %arg4[%c0_40, %c0_41, %c0_42] : memref<4x16x128xf32, #tpu.memory_space<vmem>>, vector<4x16x128xf32>
    tpu.vector_store %arg4[%c0_40, %c0_41, %c0_42], %121 {strides = array<i32>} : memref<4x16x128xf32, #tpu.memory_space<vmem>>, vector<4x16x128xf32>,
    return
  }
}

</mosaic_0001>

<bundles_post_ra>
// kernel: lstm_model_forward.1
= control target key start
LH: loop header
LB: loop body
LE: loop exit
PB: predicated region body
PF: predicated region fallthrough
CT: control target
= control target key end

     0   :  { %s4004_s1 = inlined_call_operand.vmem [shape: bf16[128,512], index: 1, kind: input, shape index: {}]   ;;  %s4005_s0 = inlined_call_operand.vmem [shape: f32[4,16,512], index: 0, kind: input, shape index: {}]   ;;  %s4006_s2 = inlined_call_operand.vmem [shape: bf16[128,128], index: 2, kind: input, shape index: {}]   ;;  %s4007_s3 = inlined_call_operand.vmem [shape: f32[1,128], index: 3, kind: input, shape index: {}]   ;;  %s4008_s4 = inlined_call_operand.vmem [shape: f32[4,16,128], index: 4, kind: output, shape index: {}]  }
   0x1   :  { %v1873_v0 = vld [vmem:[%s4004_s1 + $0xe0] sm:$0xf]  ;;  %v2397_v1 = vld [vmem:[%s4004_s1 + $0xec] sm:$0xf0]  ;;  %v1881_v5 = vld [vmem:[%s4004_s1 + $0xe8] sm:$0xf] }
   0x2   :  { %v1857_v2 = vld [vmem:[%s4004_s1 + $0xc0] sm:$0xf]  ;;  %v1874_v3 = vor.u32 %v2397_v1, %v1873_v0  ;;  %v2393_v4 = vld [vmem:[%s4004_s1 + $0xcc] sm:$0xf0]  ;;  %v2398_v7 = vld [vmem:[%s4004_s1 + $0xf4] sm:$0xf0] }
   0x3   :  { %v1858_v6 = vor.u32 %v2393_v4, %v1857_v2  ;;  %v2396_v8 = vld [vmem:[%s4004_s1 + $0xec] sm:$0xf]  ;;  %v1883_v9 = vld [vmem:[%s4004_s1 + $0xf8] sm:$0xf0]  ;;  %v1841_v10 = vld [vmem:[%s4004_s1 + $0xa0] sm:$0xf]  ;;  %v1882_v12 = vor.u32 %v2398_v7, %v1881_v5 }
   0x4   :  { %218 = vmatpush.bf16.msra.mxu1 %v1874_v3  ;;  %v2389_v11 = vld [vmem:[%s4004_s1 + $0xac] sm:$0xf0]  ;;  %v1886_v13 = vor.u32 %v2396_v8, %v1883_v9  ;;  %v1865_v14 = vld [vmem:[%s4004_s1 + $0xc8] sm:$0xf]  ;;  %v2394_v15 = vld [vmem:[%s4004_s1 + $0xd4] sm:$0xf0] }
   0x5   :  { %v2392_v16 = vld [vmem:[%s4004_s1 + $0xcc] sm:$0xf]  ;;  %v1867_v17 = vld [vmem:[%s4004_s1 + $0xd8] sm:$0xf0]  ;;  %246 = vmatpush.bf16.msra.mxu2 %v1882_v12  ;;  %v1866_v18 = vor.u32 %v2394_v15, %v1865_v14  ;;  %v1849_v20 = vld [vmem:[%s4004_s1 + $0xa8] sm:$0xf]  ;;  %v1842_v21 = vor.u32 %v2389_v11, %v1841_v10 }
   0x6   :  { %260 = vmatpush.bf16.msra.mxu3 %v1886_v13  ;;  %v1870_v19 = vor.u32 %v2392_v16, %v1867_v17  ;;  %v2390_v22 = vld [vmem:[%s4004_s1 + $0xb4] sm:$0xf0]  ;;  %v2388_v23 = vld [vmem:[%s4004_s1 + $0xac] sm:$0xf]  ;;  %v1851_v24 = vld [vmem:[%s4004_s1 + $0xb8] sm:$0xf0] }
   0x7   :  { %v1825_v25 = vld [vmem:[%s4004_s1 + $0x80] sm:$0xf]  ;;  %v2385_v26 = vld [vmem:[%s4004_s1 + $0x8c] sm:$0xf0]  ;;  %v1850_v27 = vor.u32 %v2390_v22, %v1849_v20  ;;  %v1854_v28 = vor.u32 %v2388_v23, %v1851_v24  ;;  %v1833_v29 = vld [vmem:[%s4004_s1 + $0x88] sm:$0xf] }
   0x8   :  { %219 = vmatpush.bf16.msra.mxu1 %v1858_v6  ;;  %v1826_v30 = vor.u32 %v2385_v26, %v1825_v25  ;;  %v2386_v31 = vld [vmem:[%s4004_s1 + $0x94] sm:$0xf0]  ;;  %v2384_v32 = vld [vmem:[%s4004_s1 + $0x8c] sm:$0xf]  ;;  %v1835_v33 = vld [vmem:[%s4004_s1 + $0x98] sm:$0xf0] }
   0x9   :  { %247 = vmatpush.bf16.msra.mxu2 %v1866_v18  ;;  %v1809_v34 = vld [vmem:[%s4004_s1 + $0x60] sm:$0xf]  ;;  %v2381_v35 = vld [vmem:[%s4004_s1 + $0x6c] sm:$0xf0]  ;;  %v1834_v36 = vor.u32 %v2386_v31, %v1833_v29  ;;  %v1838_v37 = vor.u32 %v2384_v32, %v1835_v33  ;;  %v1817_v38 = vld [vmem:[%s4004_s1 + $0x68] sm:$0xf] }
   0xa   :  { %261 = vmatpush.bf16.msra.mxu3 %v1870_v19  ;;  %v1810_v39 = vor.u32 %v2381_v35, %v1809_v34  ;;  %v2382_v40 = vld [vmem:[%s4004_s1 + $0x74] sm:$0xf0]  ;;  %v2380_v41 = vld [vmem:[%s4004_s1 + $0x6c] sm:$0xf]  ;;  %v1819_v42 = vld [vmem:[%s4004_s1 + $0x78] sm:$0xf0] }
   0xb   :  { %v1793_v43 = vld [vmem:[%s4004_s1 + $0x40] sm:$0xf]  ;;  %v2377_v44 = vld [vmem:[%s4004_s1 + $0x4c] sm:$0xf0]  ;;  %v1818_v45 = vor.u32 %v2382_v40, %v1817_v38  ;;  %v1822_v46 = vor.u32 %v2380_v41, %v1819_v42  ;;  %v1801_v47 = vld [vmem:[%s4004_s1 + $0x48] sm:$0xf] }
   0xc   :  { %220 = vmatpush.bf16.msra.mxu1 %v1842_v21  ;;  %v1794_v48 = vor.u32 %v2377_v44, %v1793_v43  ;;  %v2378_v49 = vld [vmem:[%s4004_s1 + $0x54] sm:$0xf0]  ;;  %v2376_v50 = vld [vmem:[%s4004_s1 + $0x4c] sm:$0xf]  ;;  %v1803_v51 = vld [vmem:[%s4004_s1 + $0x58] sm:$0xf0] }
   0xd   :  { %248 = vmatpush.bf16.msra.mxu2 %v1850_v27  ;;  %v1777_v52 = vld [vmem:[%s4004_s1 + $0x20] sm:$0xf]  ;;  %v2373_v53 = vld [vmem:[%s4004_s1 + $0x2c] sm:$0xf0]  ;;  %v1802_v54 = vor.u32 %v2378_v49, %v1801_v47  ;;  %v1806_v55 = vor.u32 %v2376_v50, %v1803_v51  ;;  %v1785_v56 = vld [vmem:[%s4004_s1 + $0x28] sm:$0xf] }
   0xe   :  { %262 = vmatpush.bf16.msra.mxu3 %v1854_v28  ;;  %v1778_v57 = vor.u32 %v2373_v53, %v1777_v52  ;;  %v2374_v58 = vld [vmem:[%s4004_s1 + $0x34] sm:$0xf0]  ;;  %v2372_v59 = vld [vmem:[%s4004_s1 + $0x2c] sm:$0xf]  ;;  %v1787_v60 = vld [vmem:[%s4004_s1 + $0x38] sm:$0xf0] }
   0xf   :  { %v1761_v61 = vld [vmem:[%s4004_s1] sm:$0xf]  ;;  %v2369_v62 = vld [vmem:[%s4004_s1 + $0xc] sm:$0xf0]  ;;  %v2395_v63 = vld [vmem:[%s4004_s1 + $0xe4] sm:$0xf]  ;;  %v1786_v1 = vor.u32 %v2374_v58, %v1785_v56  ;;  %v1790_v2 = vor.u32 %v2372_v59, %v1787_v60 }
  0x10   :  { %221 = vmatpush.bf16.msra.mxu1 %v1826_v30  ;;  %v1875_v0 = vld [vmem:[%s4004_s1 + $0xf0] sm:$0xf0]  ;;  %v1762_v3 = vor.u32 %v2369_v62, %v1761_v61  ;;  %v1769_v4 = vld [vmem:[%s4004_s1 + $0x8] sm:$0xf]  ;;  %v2370_v5 = vld [vmem:[%s4004_s1 + $0x14] sm:$0xf0] }
  0x11   :  { %249 = vmatpush.bf16.msra.mxu2 %v1834_v36  ;;  %v1878_v6 = vor.u32 %v2395_v63, %v1875_v0  ;;  %v2368_v7 = vld [vmem:[%s4004_s1 + $0xc] sm:$0xf]  ;;  %v1771_v8 = vld [vmem:[%s4004_s1 + $0x18] sm:$0xf0]  ;;  %v2391_v9 = vld [vmem:[%s4004_s1 + $0xc4] sm:$0xf]  ;;  %v1770_v11 = vor.u32 %v2370_v5, %v1769_v4 }
  0x12   :  { %263 = vmatpush.bf16.msra.mxu3 %v1838_v37  ;;  %v1859_v10 = vld [vmem:[%s4004_s1 + $0xd0] sm:$0xf0]  ;;  %v1774_v12 = vor.u32 %v2368_v7, %v1771_v8  ;;  %v2387_v14 = vld [vmem:[%s4004_s1 + $0xa4] sm:$0xf]  ;;  %v2657_v16 = vmov 0   ;;  %v19_v7 = vld [vmem:[%s4005_s0 + $0x8] sm:$0xff] }
  0x13   :  { %v1862_v13 = vor.u32 %v2391_v9, %v1859_v10  ;;  %v1843_v15 = vld [vmem:[%s4004_s1 + $0xb0] sm:$0xf0]  ;;  %v2383_v18 = vld [vmem:[%s4004_s1 + $0x84] sm:$0xf]  ;;  %v2015_v36 = vld [vmem:[%s4004_s1 + $0xe0] sm:$0xf] }
  0x14   :  { %222 = vmatpush.bf16.msra.mxu1 %v1810_v39  ;;  %v1846_v17 = vor.u32 %v2387_v14, %v1843_v15  ;;  %v1827_v19 = vld [vmem:[%s4004_s1 + $0x90] sm:$0xf0]  ;;  %v2379_v21 = vld [vmem:[%s4004_s1 + $0x64] sm:$0xf]  ;;  %v2429_v37 = vld [vmem:[%s4004_s1 + $0xec] sm:$0xf0] }
  0x15   :  { %250 = vmatpush.bf16.msra.mxu2 %v1818_v45  ;;  %v1830_v20 = vor.u32 %v2383_v18, %v1827_v19  ;;  %v1811_v22 = vld [vmem:[%s4004_s1 + $0x70] sm:$0xf0]  ;;  %v2375_v24 = vld [vmem:[%s4004_s1 + $0x44] sm:$0xf]  ;;  %v2016_v38 = vor.u32 %v2429_v37, %v2015_v36  ;;  %v1999_v42 = vld [vmem:[%s4004_s1 + $0xc0] sm:$0xf] }
  0x16   :  { %264 = vmatpush.bf16.msra.mxu3 %v1822_v46  ;;  %v1814_v23 = vor.u32 %v2379_v21, %v1811_v22  ;;  %v1795_v25 = vld [vmem:[%s4004_s1 + $0x50] sm:$0xf0]  ;;  %v2371_v27 = vld [vmem:[%s4004_s1 + $0x24] sm:$0xf]  ;;  %v2425_v43 = vld [vmem:[%s4004_s1 + $0xcc] sm:$0xf0] }
  0x17   :  { %v1798_v26 = vor.u32 %v2375_v24, %v1795_v25  ;;  %v1779_v28 = vld [vmem:[%s4004_s1 + $0x30] sm:$0xf0]  ;;  %v2367_v30 = vld [vmem:[%s4004_s1 + $0x4] sm:$0xf]  ;;  %v2000_v45 = vor.u32 %v2425_v43, %v1999_v42  ;;  %v1983_v47 = vld [vmem:[%s4004_s1 + $0xa0] sm:$0xf] }
  0x18   :  { %223 = vmatpush.bf16.msra.mxu1 %v1794_v48  ;;  %v1782_v29 = vor.u32 %v2371_v27, %v1779_v28  ;;  %v1763_v31 = vld [vmem:[%s4004_s1 + $0x10] sm:$0xf0]  ;;  %v18_v34 = vld [vmem:[%s4005_s0] sm:$0xff]  ;;  %v2421_v48 = vld [vmem:[%s4004_s1 + $0xac] sm:$0xf0] }
  0x19   :  { %251 = vmatpush.bf16.msra.mxu2 %v1802_v54  ;;  %v1766_v32 = vor.u32 %v2367_v30, %v1763_v31  ;;  %v22_v40 = vld [vmem:[%s4005_s0 + $0x20] sm:$0xff]  ;;  %v1984_v49 = vor.u32 %v2421_v48, %v1983_v47  ;;  %v2417_v52 = vld [vmem:[%s4004_s1 + $0x8c] sm:$0xf0]  ;;  %v2428_v58 = vld [vmem:[%s4004_s1 + $0xec] sm:$0xf] }
  0x1a   :  { %265 = vmatpush.bf16.msra.mxu3 %v1806_v55  ;;  %v1967_v51 = vld [vmem:[%s4004_s1 + $0x80] sm:$0xf]  ;;  %v20_v54 = vld [vmem:[%s4005_s0 + $0x10] sm:$0xff]  ;;  %v2427_v55 = vld [vmem:[%s4004_s1 + $0xe4] sm:$0xf] }
  0x1b   :  { %v1968_v56 = vor.u32 %v2417_v52, %v1967_v51  ;;  %v2025_v59 = vld [vmem:[%s4004_s1 + $0xf8] sm:$0xf0]  ;;  %v1951_v0 = vld [vmem:[%s4004_s1 + $0x60] sm:$0xf]  ;;  %v2423_v5 = vld [vmem:[%s4004_s1 + $0xc4] sm:$0xf] }
  0x1c   :  { %224 = vmatpush.bf16.msra.mxu1 %v1778_v57  ;;  %v2017_v57 = vld [vmem:[%s4004_s1 + $0xf0] sm:$0xf0]  ;;  %v2028_v63 = vor.u32 %v2428_v58, %v2025_v59  ;;  %v2424_v9 = vld [vmem:[%s4004_s1 + $0xcc] sm:$0xf]  ;;  %v2009_v10 = vld [vmem:[%s4004_s1 + $0xd8] sm:$0xf0] }
  0x1d   :  { %252 = vmatpush.bf16.msra.mxu2 %v1786_v1  ;;  %v2020_v62 = vor.u32 %v2427_v55, %v2017_v57  ;;  %v2413_v1 = vld [vmem:[%s4004_s1 + $0x6c] sm:$0xf0]  ;;  %v1985_v21 = vld [vmem:[%s4004_s1 + $0xb0] sm:$0xf0]  ;;  %v2420_v22 = vld [vmem:[%s4004_s1 + $0xac] sm:$0xf] }
  0x1e   :  { %266 = vmatpush.bf16.msra.mxu3 %v1790_v2  ;;  %v24_v2 = vld [vmem:[%s4005_s0 + $0x30] sm:$0xff]  ;;  %v1952_v4 = vor.u32 %v2413_v1, %v1951_v0  ;;  %v2416_v37 = vld [vmem:[%s4004_s1 + $0x8c] sm:$0xf]  ;;  %v2023_v48 = vld [vmem:[%s4004_s1 + $0xe8] sm:$0xf] }
  0x1f   :  { %v2405_v30 = vld [vmem:[%s4004_s1 + $0x2c] sm:$0xf0]  ;;  %v1953_v47 = vld [vmem:[%s4004_s1 + $0x70] sm:$0xf0]  ;;  %v2430_v52 = vld [vmem:[%s4004_s1 + $0xf4] sm:$0xf0] }
  0x20   :  { %225 = vmatpush.bf16.msra.mxu1 %v1762_v3  ;;  %v2401_v42 = vld [vmem:[%s4004_s1 + $0xc] sm:$0xf0]  ;;  %v2024_v57 = vor.u32 %v2430_v52, %v2023_v48  ;;  %v2407_v59 = vld [vmem:[%s4004_s1 + $0x44] sm:$0xf]  ;;  %v2007_v0 = vld [vmem:[%s4004_s1 + $0xc8] sm:$0xf] }
  0x21   :  { %253 = vmatpush.bf16.msra.mxu2 %v1770_v11  ;;  %v2012_v11 = vor.u32 %v2424_v9, %v2009_v10  ;;  %v2426_v1 = vld [vmem:[%s4004_s1 + $0xd4] sm:$0xf0]  ;;  %v2403_v10 = vld [vmem:[%s4004_s1 + $0x24] sm:$0xf] }
  0x22   :  { %267 = vmatpush.bf16.msra.mxu3 %v1774_v12 }
  0x23   :  { %226 = vmatmul.bf16.vlgmr.msra.gmra.mxu1 %v2657_v16 }
  0x24   :  { %232 = vmatpush.bf16.msrb.mxu1 %v1878_v6  ;;  %254 = vmatmul.bf16.vlgmr.msra.gmra.mxu2 %v2657_v16  ;;  %v2001_v6 = vld [vmem:[%s4004_s1 + $0xd0] sm:$0xf0] }
  0x25   :  { %268 = vmatmul.bf16.vlgmr.msra.gmra.mxu3 %v2657_v16  ;;  %619 = vmatpush.bf16.msrb.mxu2 %v2016_v38  ;;  %v2004_v8 = vor.u32 %v2423_v5, %v2001_v6  ;;  %v1977_v38 = vld [vmem:[%s4004_s1 + $0x98] sm:$0xf0]  ;;  %v2008_v5 = vor.u32 %v2426_v1, %v2007_v0  ;;  %v2408_v6 = vld [vmem:[%s4004_s1 + $0x4c] sm:$0xf]  ;;  %v2410_v0 = vld [vmem:[%s4004_s1 + $0x54] sm:$0xf0] }
  0x26   :  { %661 = vmatpush.bf16.msrb.mxu3 %v2028_v63 }
  0x28   :  { %233 = vmatpush.bf16.msrb.mxu1 %v1862_v13 }
  0x29   :  { %620 = vmatpush.bf16.msrb.mxu2 %v2000_v45 }
  0x2a   :  { %662 = vmatpush.bf16.msrb.mxu3 %v2012_v11  ;;  %v1991_v11 = vld [vmem:[%s4004_s1 + $0xa8] sm:$0xf] }
  0x2c   :  { %234 = vmatpush.bf16.msrb.mxu1 %v1846_v17  ;;  %v2409_v17 = vld [vmem:[%s4004_s1 + $0x4c] sm:$0xf0] }
  0x2d   :  { %621 = vmatpush.bf16.msrb.mxu2 %v1984_v49 }
  0x30   :  { %235 = vmatpush.bf16.msrb.mxu1 %v1830_v20  ;;  %v2419_v20 = vld [vmem:[%s4004_s1 + $0xa4] sm:$0xf] }
  0x31   :  { %622 = vmatpush.bf16.msrb.mxu2 %v1968_v56  ;;  %v1988_v27 = vor.u32 %v2419_v20, %v1985_v21 }
  0x34   :  { %236 = vmatpush.bf16.msrb.mxu1 %v1814_v23  ;;  %v1993_v23 = vld [vmem:[%s4004_s1 + $0xb8] sm:$0xf0] }
  0x35   :  { %623 = vmatpush.bf16.msrb.mxu2 %v1952_v4  ;;  %v1996_v28 = vor.u32 %v2420_v22, %v1993_v23 }
  0x37   :  { %663 = vmatpush.bf16.msrb.mxu3 %v1996_v28  ;;  %v2418_v28 = vld [vmem:[%s4004_s1 + $0x94] sm:$0xf0] }
  0x38   :  { %237 = vmatpush.bf16.msrb.mxu1 %v1798_v26 }
  0x3c   :  { %238 = vmatpush.bf16.msrb.mxu1 %v1782_v29  ;;  %v1919_v29 = vld [vmem:[%s4004_s1 + $0x20] sm:$0xf] }
  0x3d   :  { %v1920_v31 = vor.u32 %v2405_v30, %v1919_v29  ;;  %v1905_v30 = vld [vmem:[%s4004_s1 + $0x10] sm:$0xf0] }
  0x40   :  { %239 = vmatpush.bf16.msrb.mxu1 %v1766_v32  ;;  %v2415_v32 = vld [vmem:[%s4004_s1 + $0x84] sm:$0xf] }
  0x43   :  { %240 = vmatmul.bf16.vlgmr.msrb.gmra.mxu1 %v2657_v16  ;;  %v1935_v16 = vld [vmem:[%s4004_s1 + $0x40] sm:$0xf] }
  0x44   :  { %633 = vmatpush.bf16.msra.mxu1 %v2020_v62  ;;  %v1936_v19 = vor.u32 %v2409_v17, %v1935_v16  ;;  %v21_v62 = vld [vmem:[%s4005_s0 + $0x18] sm:$0xff] }
  0x46   :  { %624 = vmatpush.bf16.msrb.mxu2 %v1936_v19  ;;  %v1929_v19 = vld [vmem:[%s4004_s1 + $0x38] sm:$0xf0] }
  0x48   :  { %634 = vmatpush.bf16.msra.mxu1 %v2004_v8 }
  0x4a   :  { %625 = vmatpush.bf16.msrb.mxu2 %v1920_v31  ;;  %v2400_v31 = vld [vmem:[%s4004_s1 + $0xc] sm:$0xf] }
  0x4c   :  { %635 = vmatpush.bf16.msra.mxu1 %v1988_v27  ;;  %v1975_v27 = vld [vmem:[%s4004_s1 + $0x88] sm:$0xf] }
  0xa0   :  { %v227_v33 = vpop.f32.mrf.mxu1 }
  0xa1   :  { %v274_v35 = vadd.f32 %v227_v33, %v18_v34  ;;  %v1969_v33 = vld [vmem:[%s4004_s1 + $0x90] sm:$0xf0] }
  0xa2   :  { %v1972_v36 = vor.u32 %v2415_v32, %v1969_v33  ;;  %v1913_v32 = vld [vmem:[%s4004_s1 + $0x18] sm:$0xf0] }
  0xa3   :  { %v1887_v39 = vmul.f32 -1.442695, %v274_v35  ;;  %v23_v35 = vld [vmem:[%s4005_s0 + $0x28] sm:$0xff] }
  0xa4   :  { %636 = vmatpush.bf16.msra.mxu1 %v1972_v36 }
  0xa5   :  { %2529 = vpow2.f32 %v1887_v39  ;;  %v1980_v39 = vor.u32 %v2416_v37, %v1977_v38  ;;  %v25_v37 = vld [vmem:[%s4005_s0 + $0x38] sm:$0xff] }
  0xa7   :  { %v255_v46 = vpop.f32.mrf.mxu2  ;;  %664 = vmatpush.bf16.msrb.mxu3 %v1980_v39 }
  0xa8   :  { %v229_v41 = vpop.f32.mrf.mxu1  ;;  %v276_v61 = vadd.f32 %v255_v46, %v20_v54  ;;  %v2411_v46 = vld [vmem:[%s4004_s1 + $0x64] sm:$0xf]  ;;  %v1961_v54 = vld [vmem:[%s4004_s1 + $0x78] sm:$0xf0] }
  0xa9   :  { %v278_v44 = vadd.f32 %v229_v41, %v22_v40  ;;  %v1903_v41 = vld [vmem:[%s4004_s1] sm:$0xf]  ;;  %v1956_v51 = vor.u32 %v2411_v46, %v1953_v47 }
  0xaa   :  { %v1889_v13 = vmul.f32 -1.442695, %v276_v61  ;;  %v1904_v45 = vor.u32 %v2401_v42, %v1903_v41  ;;  %v1937_v61 = vld [vmem:[%s4004_s1 + $0x50] sm:$0xf0]  ;;  %v1976_v42 = vor.u32 %v2418_v28, %v1975_v27 }
  0xab   :  { %v1890_v50 = vmul.f32 -1.442695, %v278_v44  ;;  %v2530_v53 = vpop.eup %2529  ;;  %637 = vmatpush.bf16.msra.mxu1 %v1956_v51  ;;  %v1940_v9 = vor.u32 %v2407_v59, %v1937_v61 }
  0xac   :  { %v2920_v60 = vadd.f32 1.0, %v2530_v53  ;;  %v2412_v53 = vld [vmem:[%s4004_s1 + $0x6c] sm:$0xf]  ;;  %626 = vmatpush.bf16.msrb.mxu2 %v1904_v45  ;;  %v1916_v45 = vor.u32 %v2400_v31, %v1913_v32  ;;  %v1911_v31 = vld [vmem:[%s4004_s1 + $0x8] sm:$0xf] }
  0xad   :  { %2531 = vpow2.f32 %v1890_v50  ;;  %v269_v50 = vpop.f32.mrf.mxu3  ;;  %v1964_v58 = vor.u32 %v2412_v53, %v1961_v54 }
  0xae   :  { %2533 = vrcp.f32 %v2920_v60  ;;  %v277_v17 = vadd.f32 %v269_v50, %v21_v62  ;;  %vm311_vm0 = vweird.f32 %v2920_v60  ;;  %v317_v36 = vand.u32 2147483648, %v2920_v60  ;;  %v1943_v62 = vld [vmem:[%s4004_s1 + $0x48] sm:$0xf] }
  0xaf   :  { %v257_v3 = vpop.f32.mrf.mxu2  ;;  %2535 = vpow2.f32 %v1889_v13  ;;  %665 = vmatpush.bf16.msrb.mxu3 %v1964_v58  ;;  %v1921_v13 = vld [vmem:[%s4004_s1 + $0x30] sm:$0xf0]  ;;  %638 = vmatpush.bf16.msra.mxu1 %v1940_v9 }
  0xb0   :  { %v280_v14 = vadd.f32 %v257_v3, %v24_v2  ;;  %647 = vmatpush.bf16.msra.mxu2 %v2024_v57  ;;  %v1924_v23 = vor.u32 %v2403_v10, %v1921_v13  ;;  %v318_v50 = vor.u32 1.1754944e-38, %v317_v36  ;;  %v1927_v13 = vld [vmem:[%s4004_s1 + $0x28] sm:$0xf] }
  0xb2   :  { %v1892_v26 = vmul.f32 -1.442695, %v280_v14  ;;  %v2422_v14 = vld [vmem:[%s4004_s1 + $0xb4] sm:$0xf0] }
  0xb3   :  { %v2532_v12 = vpop.eup %2531  ;;  %v1992_v22 = vor.u32 %v2422_v14, %v1991_v11  ;;  %639 = vmatpush.bf16.msra.mxu1 %v1924_v23  ;;  %v2406_v14 = vld [vmem:[%s4004_s1 + $0x34] sm:$0xf0] }
  0xb4   :  { %v2965_v24 = vadd.f32 1.0, %v2532_v12  ;;  %v2979_v34 = vpop.eup %2533  ;;  %648 = vmatpush.bf16.msra.mxu2 %v2008_v5  ;;  %v1928_v28 = vor.u32 %v2406_v14, %v1927_v13  ;;  %v2165_v13 = vld [vmem:[%s4004_s1 + $0xe8] sm:$0xf]  ;;  %v2462_v14 = vld [vmem:[%s4004_s1 + $0xf4] sm:$0xf0] }
  0xb5   :  { %v307_v43 = vmul.f32 %v2979_v34, %v2920_v60  ;;  %v2536_v49 = vpop.eup %2535  ;;  %vm312_vm1 = vweird.f32 %v2979_v34  ;;  %v271_v38 = vpop.f32.mrf.mxu3 }
  0xb6   :  { %v3036_v4 = vadd.f32 1.0, %v2536_v49  ;;  %vm3103_vm2 = vmor %vm311_vm0, %vm312_vm1  ;;  %v281_v48 = vadd.f32 %v271_v38, %v25_v37  ;;  %vm356_vm6 = vweird.f32 %v2965_v24 }
  0xb7   :  { %v308_v3 = vsub.f32 1.0, %v307_v43  ;;  %v2125_v43 = vld [vmem:[%s4004_s1 + $0xa0] sm:$0xf] }
  0xb8   :  { %649 = vmatpush.bf16.msra.mxu2 %v1992_v22  ;;  %vm341_vm12 = vweird.f32 %v3036_v4 }
  0xb9   :  { %v309_v20 = vmul.f32 %v2979_v34, %v308_v3 }
  0xbc   :  { %650 = vmatpush.bf16.msra.mxu2 %v1976_v42 }
  0xc0   :  { %v241_v15 = vpop.f32.mrf.mxu1 }
  0xc1   :  { %v275_v18 = vadd.f32 %v241_v15, %v19_v7  ;;  %v1945_v7 = vld [vmem:[%s4004_s1 + $0x58] sm:$0xf0]  ;;  %v2404_v15 = vld [vmem:[%s4004_s1 + $0x2c] sm:$0xf] }
  0xc2   :  { %v1948_v12 = vor.u32 %v2408_v6, %v1945_v7 }
  0xc3   :  { %v1888_v25 = vmul.f32 -1.442695, %v275_v18  ;;  %v315_v18 = vand.u32 2147483647, %v2920_v60 }
  0xc4   :  { %666 = vmatpush.bf16.msrb.mxu3 %v1948_v12  ;;  %v362_v12 = vand.u32 2147483648, %v2965_v24 }
  0xc5   :  { %2537 = vpow2.f32 %v1888_v25  ;;  %v1932_v25 = vor.u32 %v2404_v15, %v1929_v19  ;;  %vm3110_vm3 = vcmp.eq.f32.partialorder %v315_v18, 8.507059e+37  ;;  %v360_v18 = vand.u32 2147483647, %v2965_v24 }
  0xc6   :  { %2539 = vrcp.f32 %v2965_v24 }
  0xc7   :  { %2541 = vpow2.f32 %v1892_v26  ;;  %v2399_v26 = vld [vmem:[%s4004_s1 + $0x4] sm:$0xf]  ;;  %vm361_vm13 = vcmp.eq.f32.partialorder %v360_v18, 8.507059e+37  ;;  %v2460_v18 = vld [vmem:[%s4004_s1 + $0xec] sm:$0xf] }
  0xc8   :  { %v243_v40 = vpop.f32.mrf.mxu1  ;;  %667 = vmatpush.bf16.msrb.mxu3 %v1932_v25 }
  0xc9   :  { %v279_v44 = vadd.f32 %v243_v40, %v23_v35  ;;  %v310_v40 = vadd.f32 %v2979_v34, %v309_v20 }
  0xcb   :  { %v2538_v55 = vpop.eup %2537  ;;  %v1891_v56 = vmul.f32 -1.442695, %v279_v44  ;;  %v1908_v44 = vor.u32 %v2399_v26, %v1905_v30  ;;  %v314_v52 = vsel %vm3103_vm2, %v2979_v34, %v310_v40 }
  0xcc   :  { %v3026_v63 = vadd.f32 1.0, %v2538_v55  ;;  %v3034_v2 = vpop.eup %2539  ;;  %v1959_v55 = vld [vmem:[%s4004_s1 + $0x68] sm:$0xf]  ;;  %668 = vmatpush.bf16.msrb.mxu3 %v1916_v45  ;;  %v319_v3 = vsel %vm3110_vm3, %v318_v50, %v314_v52 }
  0xcd   :  { %2543 = vpow2.f32 %v1891_v56  ;;  %v2542_v8 = vpop.eup %2541  ;;  %v352_v16 = vmul.f32 %v3034_v2, %v2965_v24  ;;  %v2414_v56 = vld [vmem:[%s4004_s1 + $0x74] sm:$0xf0]  ;;  %640 = vmatpush.bf16.msra.mxu1 %v1908_v44  ;;  %vm357_vm8 = vweird.f32 %v3034_v2  ;;  %v363_v24 = vor.u32 1.1754944e-38, %v362_v12  ;;  %v2159_v12 = vld [vmem:[%s4004_s1 + $0xf0] sm:$0xf0] }
  0xce   :  { %2545 = vrcp.f32 %v3026_v63  ;;  %v3068_v21 = vadd.f32 1.0, %v2542_v8  ;;  %v332_v60 = vand.u32 2147483648, %v3026_v63  ;;  %v330_v54 = vand.u32 2147483647, %v3026_v63  ;;  %vm3155_vm10 = vmor %vm356_vm6, %vm357_vm8 }
  0xcf   :  { %2547 = vrcp.f32 %v3036_v4  ;;  %v353_v35 = vsub.f32 1.0, %v352_v16  ;;  %v1960_v34 = vor.u32 %v2414_v56, %v1959_v55  ;;  %vm326_vm5 = vweird.f32 %v3026_v63 }
  0xd0   :  { %2549 = vtanh.f32 %v277_v17  ;;  %v333_v5 = vor.u32 1.1754944e-38, %v332_v60  ;;  %vm331_vm9 = vcmp.eq.f32.partialorder %v330_v54, 8.507059e+37  ;;  %v1944_v8 = vor.u32 %v2410_v0, %v1943_v62 }
  0xd1   :  { %2551 = vrcp.f32 %v3068_v21  ;;  %v354_v51 = vmul.f32 %v3034_v2, %v353_v35  ;;  %651 = vmatpush.bf16.msra.mxu2 %v1960_v34  ;;  %vm386_vm3 = vweird.f32 %v3068_v21  ;;  %v390_v60 = vand.u32 2147483647, %v3068_v21 }
  0xd2   :  { %v2166_v17 = vor.u32 %v2462_v14, %v2165_v13  ;;  %v2093_v13 = vld [vmem:[%s4004_s1 + $0x60] sm:$0xf]  ;;  %v2445_v14 = vld [vmem:[%s4004_s1 + $0x6c] sm:$0xf0] }
  0xd3   :  { %v2544_v29 = vpop.eup %2543 }
  0xd4   :  { %v2546_v33 = vpop.eup %2545  ;;  %v3094_v39 = vadd.f32 1.0, %v2544_v29 }
  0xd5   :  { %v322_v41 = vmul.f32 %v2546_v33, %v3026_v63  ;;  %v3108_v46 = vpop.eup %2547  ;;  %vm327_vm4 = vweird.f32 %v2546_v33  ;;  %v355_v63 = vadd.f32 %v3034_v2, %v354_v51  ;;  %652 = vmatpush.bf16.msra.mxu2 %v1944_v8  ;;  %v2461_v8 = vld [vmem:[%s4004_s1 + $0xec] sm:$0xf0] }
  0xd6   :  { %2553 = vrcp.f32 %v3094_v39  ;;  %v2550_v57 = vpop.eup %2549  ;;  %v337_v58 = vmul.f32 %v3108_v46, %v3036_v4  ;;  %vm328_vm7 = vmor %vm326_vm5, %vm327_vm4  ;;  %v375_v22 = vand.u32 2147483647, %v3094_v39  ;;  %v377_v23 = vand.u32 2147483648, %v3094_v39 }
  0xd7   :  { %v323_v47 = vsub.f32 1.0, %v322_v41  ;;  %v3128_v59 = vpop.eup %2551  ;;  %2555 = vtanh.f32 %v281_v48  ;;  %v400_v15 = vmul.f32 %v2550_v57, %v319_v3  ;;  %v359_v20 = vsel %vm3155_vm10, %v3034_v2, %v355_v63  ;;  %v2402_v2 = vld [vmem:[%s4004_s1 + $0x14] sm:$0xf0]  ;;  %v1893_v63 = vld [vmem:[%s4005_s0 + $0x40] sm:$0xff] }
  0xd8   :  { %v338_v9 = vsub.f32 1.0, %v337_v58  ;;  %v382_v10 = vmul.f32 %v3128_v59, %v3068_v21  ;;  %vm371_vm14 = vweird.f32 %v3094_v39  ;;  %vm342_vm15 = vweird.f32 %v3108_v46 }
  0xd9   :  { %v324_v53 = vmul.f32 %v2546_v33, %v323_v47  ;;  %v364_v35 = vsel %vm361_vm13, %v363_v24, %v359_v20  ;;  %v378_v36 = vor.u32 1.1754944e-38, %v377_v23  ;;  %vm376_vm1 = vcmp.eq.f32.partialorder %v375_v22, 8.507059e+37  ;;  %653 = vmatpush.bf16.msra.mxu2 %v1928_v28  ;;  %vm3185_vm2 = vmor %vm341_vm12, %vm342_vm15  ;;  %v2457_v28 = vld [vmem:[%s4004_s1 + $0xcc] sm:$0xf0]  ;;  %v2143_v24 = vld [vmem:[%s4004_s1 + $0xd0] sm:$0xf0] }
  0xda   :  { %v339_v29 = vmul.f32 %v3108_v46, %v338_v9  ;;  %v383_v30 = vsub.f32 1.0, %v382_v10  ;;  %v1912_v38 = vor.u32 %v2402_v2, %v1911_v31  ;;  %vm387_vm4 = vweird.f32 %v3128_v59  ;;  %v2459_v9 = vld [vmem:[%s4004_s1 + $0xe4] sm:$0xf]  ;;  %v2149_v31 = vld [vmem:[%s4004_s1 + $0xc8] sm:$0xf] }
  0xdb   :  { %v325_v61 = vadd.f32 %v2546_v33, %v324_v53  ;;  %v392_v48 = vand.u32 2147483648, %v3068_v21  ;;  %vm388_vm6 = vmor %vm386_vm3, %vm387_vm4 }
  0xdc   :  { %v2554_v1 = vpop.eup %2553  ;;  %v384_v40 = vmul.f32 %v3128_v59, %v383_v30  ;;  %v340_v42 = vadd.f32 %v3108_v46, %v339_v29  ;;  %v2455_v30 = vld [vmem:[%s4004_s1 + $0xc4] sm:$0xf] }
  0xdd   :  { %v329_v6 = vsel %vm328_vm7, %v2546_v33, %v325_v61  ;;  %v367_v7 = vmul.f32 %v2554_v1, %v3094_v39  ;;  %v2556_v25 = vpop.eup %2555  ;;  %vm372_vm11 = vweird.f32 %v2554_v1  ;;  %v347_v33 = vand.u32 2147483648, %v3036_v4  ;;  %654 = vmatpush.bf16.msra.mxu2 %v1912_v38  ;;  %v1897_v38 = vld [vmem:[%s4005_s0 + $0x60] sm:$0xff] }
  0xde   :  { %v334_v11 = vsel %vm331_vm9, %v333_v5, %v329_v6  ;;  %vm373_vm0 = vmor %vm371_vm14, %vm372_vm11  ;;  %v345_v39 = vand.u32 2147483647, %v3036_v4  ;;  %v401_v44 = vmul.f32 %v2556_v25, %v364_v35  ;;  %v344_v4 = vsel %vm3185_vm2, %v3108_v46, %v340_v42  ;;  %v1898_v6 = vld [vmem:[%s4005_s0 + $0x68] sm:$0xff]  ;;  %v2458_v35 = vld [vmem:[%s4004_s1 + $0xd4] sm:$0xf0] }
  0xdf   :  { %v398_v16 = vmul.f32 0.0, %v334_v11  ;;  %v368_v19 = vsub.f32 1.0, %v367_v7  ;;  %v348_v47 = vor.u32 1.1754944e-38, %v347_v33  ;;  %v385_v50 = vadd.f32 %v3128_v59, %v384_v40  ;;  %v2157_v7 = vld [vmem:[%s4004_s1 + $0xe0] sm:$0xf] }
  0xe0   :  { %vm346_vm5 = vcmp.eq.f32.partialorder %v345_v39, 8.507059e+37  ;;  %v393_v52 = vor.u32 1.1754944e-38, %v392_v48  ;;  %vm391_vm7 = vcmp.eq.f32.partialorder %v390_v60, 8.507059e+37  ;;  %v2158_v11 = vor.u32 %v2461_v8, %v2157_v7  ;;  %v2127_v48 = vld [vmem:[%s4004_s1 + $0xb0] sm:$0xf0]  ;;  %v1896_v7 = vld [vmem:[%s4005_s0 + $0x58] sm:$0xff] }
  0xe1   :  { %v3165_v26 = vadd.f32 %v400_v15, %v398_v16  ;;  %v369_v27 = vmul.f32 %v2554_v1, %v368_v19  ;;  %v349_v53 = vsel %vm346_vm5, %v348_v47, %v344_v4  ;;  %v389_v54 = vsel %vm388_vm6, %v3128_v59, %v385_v50  ;;  %v1894_v59 = vld [vmem:[%s4005_s0 + $0x48] sm:$0xff]  ;;  %v2167_v19 = vld [vmem:[%s4004_s1 + $0xf8] sm:$0xf0] }
  0xe2   :  { %v394_v57 = vsel %vm391_vm7, %v393_v52, %v389_v54  ;;  %v2162_v16 = vor.u32 %v2459_v9, %v2159_v12  ;;  %1021 = vmatpush.bf16.msra.mxu0 %v2158_v11  ;;  %v2170_v22 = vor.u32 %v2460_v18, %v2167_v19  ;;  %v2146_v33 = vor.u32 %v2455_v30, %v2143_v24  ;;  %v2454_v52 = vld [vmem:[%s4004_s1 + $0xb4] sm:$0xf0]  ;;  %v2119_v8 = vld [vmem:[%s4004_s1 + $0x98] sm:$0xf0]  ;;  %v1895_v11 = vld [vmem:[%s4005_s0 + $0x50] sm:$0xff] }
  0xe3   :  { %v370_v32 = vadd.f32 %v2554_v1, %v369_v27  ;;  %2557 = vtanh.f32 %v3165_v26  ;;  %v2141_v27 = vld [vmem:[%s4004_s1 + $0xc0] sm:$0xf]  ;;  %v2150_v40 = vor.u32 %v2458_v35, %v2149_v31  ;;  %v2443_v18 = vld [vmem:[%s4004_s1 + $0x64] sm:$0xf]  ;;  %v2095_v19 = vld [vmem:[%s4004_s1 + $0x70] sm:$0xf0] }
  0xe4   :  { %1035 = vmatpush.bf16.msrb.mxu1 %v2162_v16  ;;  %1063 = vmatpush.bf16.msra.mxu3 %v2170_v22  ;;  %v2142_v29 = vor.u32 %v2457_v28, %v2141_v27  ;;  %v1900_v22 = vld [vmem:[%s4005_s0 + $0x78] sm:$0xff]  ;;  %v2444_v24 = vld [vmem:[%s4004_s1 + $0x6c] sm:$0xf] }
  0xe5   :  { %v374_v37 = vsel %vm373_vm0, %v2554_v1, %v370_v32  ;;  %v2446_v27 = vld [vmem:[%s4004_s1 + $0x74] sm:$0xf0]  ;;  %v2103_v31 = vld [vmem:[%s4004_s1 + $0x78] sm:$0xf0] }
  0xe6   :  { %v379_v41 = vsel %vm376_vm1, %v378_v36, %v374_v37  ;;  %v2456_v36 = vld [vmem:[%s4004_s1 + $0xcc] sm:$0xf]  ;;  %1022 = vmatpush.bf16.msra.mxu0 %v2142_v29  ;;  %v2098_v29 = vor.u32 %v2443_v18, %v2095_v19  ;;  %v2106_v35 = vor.u32 %v2444_v24, %v2103_v31  ;;  %v2071_v19 = vld [vmem:[%s4004_s1 + $0x38] sm:$0xf0] }
  0xe7   :  { %v399_v45 = vmul.f32 0.0, %v379_v41  ;;  %v2151_v41 = vld [vmem:[%s4004_s1 + $0xd8] sm:$0xf0] }
  0xe8   :  { %1036 = vmatpush.bf16.msrb.mxu1 %v2146_v33  ;;  %v2154_v39 = vor.u32 %v2456_v36, %v2151_v41  ;;  %v2077_v36 = vld [vmem:[%s4004_s1 + $0x40] sm:$0xf] }
  0xe9   :  { %v3192_v49 = vadd.f32 %v401_v44, %v399_v45  ;;  %v2558_v51 = vpop.eup %2557  ;;  %v2453_v44 = vld [vmem:[%s4004_s1 + $0xac] sm:$0xf0]  ;;  %v2451_v45 = vld [vmem:[%s4004_s1 + $0xa4] sm:$0xf] }
  0xea   :  { %v406_v55 = vmul.f32 %v2558_v51, %v349_v53  ;;  %1064 = vmatpush.bf16.msra.mxu3 %v2154_v39  ;;  %v2126_v50 = vor.u32 %v2453_v44, %v2125_v43  ;;  %v2130_v60 = vor.u32 %v2451_v45, %v2127_v48  ;;  %v2133_v51 = vld [vmem:[%s4004_s1 + $0xa8] sm:$0xf]  ;;  %v2452_v53 = vld [vmem:[%s4004_s1 + $0xac] sm:$0xf]  ;;  %v1899_v43 = vld [vmem:[%s4005_s0 + $0x70] sm:$0xff] }
  0xeb   :  { %2559 = vtanh.f32 %v3192_v49  ;;  %v2134_v54 = vor.u32 %v2454_v52, %v2133_v51  ;;  %v2439_v45 = vld [vmem:[%s4004_s1 + $0x44] sm:$0xf]  ;;  %v2442_v51 = vld [vmem:[%s4004_s1 + $0x54] sm:$0xf0]  ;;  %v2440_v52 = vld [vmem:[%s4004_s1 + $0x4c] sm:$0xf] }
  0xec   :  { %v408_v34 = vpack.c.bf16 %v406_v55, %v406_v55  ;;  %1023 = vmatpush.bf16.msra.mxu0 %v2126_v50  ;;  %1037 = vmatpush.bf16.msrb.mxu1 %v2130_v60  ;;  %v2079_v50 = vld [vmem:[%s4004_s1 + $0x50] sm:$0xf0]  ;;  %v2085_v60 = vld [vmem:[%s4004_s1 + $0x48] sm:$0xf] }
  0xee   :  { %v455_v62 = vunpack.c.l.b16 %v408_v34  ;;  %v2109_v34 = vld [vmem:[%s4004_s1 + $0x80] sm:$0xf] }
  0xf1   :  { %v2560_v56 = vpop.eup %2559 }
  0xf2   :  { %v407_v58 = vmul.f32 %v2560_v56, %v394_v57 }
  0xf4   :  { %v409_v46 = vpack.c.bf16 %v407_v58, %v407_v58  ;;  %v2510_v61 = vpack.c.bf16 %v407_v58, %v406_v55  ;;  %v2135_v55 = vld [vmem:[%s4004_s1 + $0xb8] sm:$0xf0] }
  0xf5   :  { %v2138_v58 = vor.u32 %v2452_v53, %v2135_v55 }
  0xf6   :  { %2511 = vst [vmem:[#allocation2 + $0x10] sm:$0xff] %v2510_v61   ;;  %v456_v0 = vunpack.c.l.b16 %v409_v46  ;;  %v2449_v46 = vld [vmem:[%s4004_s1 + $0x8c] sm:$0xf0] }
  0xf7   :  { %1065 = vmatpush.bf16.msra.mxu3 %v2138_v58  ;;  %v2061_v58 = vld [vmem:[%s4004_s1 + $0x20] sm:$0xf] }
  0xf8   :  { %v457_v21 = vpack.c.b16 %v456_v0, %v455_v62  ;;  %v2110_v62 = vor.u32 %v2449_v46, %v2109_v34  ;;  %v2447_v0 = vld [vmem:[%s4004_s1 + $0x84] sm:$0xf] }
  0xfa   :  { %627 = vmatmul.bf16.vlgmr.msrb.gmra.mxu2 %v457_v21  ;;  %641 = vmatmul.bf16.vlgmr.msra.gmra.mxu1 %v457_v21 }
  0xfb   :  { %669 = vmatmul.bf16.vlgmr.msrb.gmra.mxu3 %v457_v21  ;;  %1049 = vmatpush.bf16.msrb.mxu2 %v2166_v17  ;;  %v2094_v17 = vor.u32 %v2445_v14, %v2093_v13  ;;  %v2436_v13 = vld [vmem:[%s4004_s1 + $0x2c] sm:$0xf] }
  0xfc   :  { %1024 = vmatpush.bf16.msra.mxu0 %v2110_v62 }
  0xff   :  { %1050 = vmatpush.bf16.msrb.mxu2 %v2150_v40 }
 0x100   :  { %1025 = vmatpush.bf16.msra.mxu0 %v2094_v17 }
 0x103   :  { %1051 = vmatpush.bf16.msrb.mxu2 %v2134_v54 }
 0x10a   :  { %655 = vmatmul.bf16.vlgmr.msra.gmra.mxu2 %v457_v21  ;;  %v2111_v21 = vld [vmem:[%s4004_s1 + $0x90] sm:$0xf0] }
 0x177   :  { %v642_v1 = vpop.f32.mrf.mxu1 }
 0x178   :  { %v676_v3 = vadd.f32 %v1894_v59, %v642_v1  ;;  %v2114_v1 = vor.u32 %v2447_v0, %v2111_v21  ;;  %v2437_v21 = vld [vmem:[%s4004_s1 + $0x2c] sm:$0xf0] }
 0x17a   :  { %v2030_v5 = vmul.f32 -1.442695, %v676_v3  ;;  %v2117_v3 = vld [vmem:[%s4004_s1 + $0x88] sm:$0xf]  ;;  %1038 = vmatpush.bf16.msrb.mxu1 %v2114_v1 }
 0x17c   :  { %2561 = vpow2.f32 %v2030_v5  ;;  %v2450_v5 = vld [vmem:[%s4004_s1 + $0x94] sm:$0xf0] }
 0x17d   :  { %v628_v10 = vpop.f32.mrf.mxu2  ;;  %v2118_v12 = vor.u32 %v2450_v5, %v2117_v3  ;;  %v2063_v5 = vld [vmem:[%s4004_s1 + $0x30] sm:$0xf0] }
 0x17e   :  { %v675_v15 = vadd.f32 %v1893_v63, %v628_v10  ;;  %v670_v42 = vpop.f32.mrf.mxu3  ;;  %v2448_v63 = vld [vmem:[%s4004_s1 + $0x8c] sm:$0xf]  ;;  %1039 = vmatpush.bf16.msrb.mxu1 %v2098_v29  ;;  %v2431_v29 = vld [vmem:[%s4004_s1 + $0x4] sm:$0xf] }
 0x17f   :  { %v644_v20 = vpop.f32.mrf.mxu1  ;;  %v2122_v16 = vor.u32 %v2448_v63, %v2119_v8  ;;  %1052 = vmatpush.bf16.msrb.mxu2 %v2118_v12  ;;  %v2069_v63 = vld [vmem:[%s4004_s1 + $0x28] sm:$0xf]  ;;  %v2086_v8 = vor.u32 %v2442_v51, %v2085_v60  ;;  %v2438_v12 = vld [vmem:[%s4004_s1 + $0x34] sm:$0xf0]  ;;  %v2432_v60 = vld [vmem:[%s4004_s1 + $0xc] sm:$0xf] }
 0x180   :  { %v2029_v23 = vmul.f32 -1.442695, %v675_v15  ;;  %v680_v25 = vadd.f32 %v1898_v6, %v644_v20  ;;  %v678_v20 = vadd.f32 %v1896_v7, %v670_v42 }
 0x181   :  { %1066 = vmatpush.bf16.msra.mxu3 %v2122_v16 }
 0x182   :  { %v2562_v2 = vpop.eup %2561  ;;  %2563 = vpow2.f32 %v2029_v23  ;;  %v2033_v32 = vmul.f32 -1.442695, %v680_v25  ;;  %v2101_v25 = vld [vmem:[%s4004_s1 + $0x68] sm:$0xf] }
 0x183   :  { %v3255_v37 = vadd.f32 1.0, %v2562_v2  ;;  %v2102_v30 = vor.u32 %v2446_v27, %v2101_v25  ;;  %v2070_v25 = vor.u32 %v2438_v12, %v2069_v63  ;;  %v2074_v27 = vor.u32 %v2436_v13, %v2071_v19 }
 0x184   :  { %2565 = vpow2.f32 %v2033_v32 }
 0x185   :  { %2567 = vrcp.f32 %v3255_v37  ;;  %v630_v47 = vpop.f32.mrf.mxu2  ;;  %v733_v33 = vand.u32 2147483648, %v3255_v37  ;;  %1053 = vmatpush.bf16.msrb.mxu2 %v2102_v30  ;;  %vm727_vm8 = vweird.f32 %v3255_v37  ;;  %1067 = vmatpush.bf16.msra.mxu3 %v2106_v35  ;;  %v2047_v30 = vld [vmem:[%s4004_s1 + $0x10] sm:$0xf0]  ;;  %v2434_v35 = vld [vmem:[%s4004_s1 + $0x14] sm:$0xf0] }
 0x186   :  { %v679_v4 = vadd.f32 %v1897_v38, %v630_v47  ;;  %v672_v23 = vpop.f32.mrf.mxu3  ;;  %v2441_v38 = vld [vmem:[%s4004_s1 + $0x4c] sm:$0xf0] }
 0x187   :  { %v682_v42 = vadd.f32 %v1900_v22, %v672_v23  ;;  %v2078_v44 = vor.u32 %v2441_v38, %v2077_v36  ;;  %v3399_v34 = vor.u32 1.1754944e-38, %v733_v33  ;;  %v2053_v33 = vld [vmem:[%s4004_s1 + $0x8] sm:$0xf] }
 0x188   :  { %v2564_v56 = vpop.eup %2563  ;;  %v2032_v57 = vmul.f32 -1.442695, %v679_v4  ;;  %v731_v4 = vand.u32 2147483647, %v3255_v37 }
 0x189   :  { %v3294_v61 = vadd.f32 1.0, %v2564_v56  ;;  %1026 = vmatpush.bf16.msra.mxu0 %v2078_v44  ;;  %v2082_v56 = vor.u32 %v2439_v45, %v2079_v50  ;;  %1054 = vmatpush.bf16.msrb.mxu2 %v2086_v8  ;;  %v2050_v50 = vor.u32 %v2431_v29, %v2047_v30 }
 0x18a   :  { %v2566_v59 = vpop.eup %2565  ;;  %2569 = vpow2.f32 %v2032_v57  ;;  %v2087_v57 = vld [vmem:[%s4004_s1 + $0x58] sm:$0xf0]  ;;  %vm732_vm1 = vcmp.eq.f32.partialorder %v731_v4, 8.507059e+37 }
 0x18b   :  { %v3311_v6 = vpop.eup %2567  ;;  %2571 = vrcp.f32 %v3294_v61  ;;  %v3322_v10 = vadd.f32 1.0, %v2566_v59  ;;  %v716_v48 = vand.u32 2147483647, %v3294_v61  ;;  %v718_v46 = vand.u32 2147483648, %v3294_v61  ;;  %v2435_v59 = vld [vmem:[%s4004_s1 + $0x24] sm:$0xf]  ;;  %1040 = vmatpush.bf16.msrb.mxu1 %v2082_v56 }
 0x18c   :  { %v723_v9 = vmul.f32 %v3311_v6, %v3255_v37  ;;  %vm728_vm9 = vweird.f32 %v3311_v6  ;;  %v2066_v18 = vor.u32 %v2435_v59, %v2063_v5  ;;  %vm712_vm11 = vweird.f32 %v3294_v61 }
 0x18d   :  { %v656_v15 = vpop.f32.mrf.mxu2  ;;  %2573 = vrcp.f32 %v3322_v10  ;;  %vm3452_vm13 = vcmp.eq.f32.partialorder %v716_v48, 8.507059e+37  ;;  %vm3468_vm14 = vmor %vm727_vm8, %vm728_vm9  ;;  %1055 = vmatpush.bf16.msrb.mxu2 %v2070_v25  ;;  %vm772_vm2 = vweird.f32 %v3322_v10  ;;  %v776_v56 = vand.u32 2147483647, %v3322_v10 }
 0x18e   :  { %v677_v28 = vadd.f32 %v1895_v11, %v656_v15  ;;  %v724_v32 = vsub.f32 1.0, %v723_v9  ;;  %2575 = vtanh.f32 %v678_v20  ;;  %v2090_v9 = vor.u32 %v2440_v52, %v2087_v57  ;;  %v2045_v20 = vld [vmem:[%s4004_s1] sm:$0xf] }
 0x18f   :  { %v2062_v11 = vor.u32 %v2437_v21, %v2061_v58  ;;  %1041 = vmatpush.bf16.msrb.mxu1 %v2066_v18  ;;  %vm777_vm7 = vcmp.eq.f32.partialorder %v776_v56, 8.507059e+37 }
 0x190   :  { %v2570_v2 = vpop.eup %2569  ;;  %v2031_v39 = vmul.f32 -1.442695, %v677_v28  ;;  %v725_v54 = vmul.f32 %v3311_v6, %v724_v32  ;;  %1068 = vmatpush.bf16.msra.mxu3 %v2090_v9  ;;  %v2433_v28 = vld [vmem:[%s4004_s1 + $0xc] sm:$0xf0] }
 0x191   :  { %v3362_v40 = vpop.eup %2571  ;;  %v3364_v41 = vadd.f32 1.0, %v2570_v2  ;;  %v719_v2 = vor.u32 1.1754944e-38, %v718_v46  ;;  %1027 = vmatpush.bf16.msra.mxu0 %v2062_v11  ;;  %v2046_v44 = vor.u32 %v2433_v28, %v2045_v20 }
 0x192   :  { %v708_v47 = vmul.f32 %v3362_v40, %v3294_v61  ;;  %vm713_vm10 = vweird.f32 %v3362_v40  ;;  %v726_v16 = vadd.f32 %v3311_v6, %v725_v54 }
 0x193   :  { %2577 = vrcp.f32 %v3364_v41  ;;  %v3390_v53 = vpop.eup %2573  ;;  %vm3448_vm12 = vmor %vm712_vm11, %vm713_vm10  ;;  %v763_v48 = vand.u32 2147483648, %v3364_v41  ;;  %1042 = vmatpush.bf16.msrb.mxu1 %v2050_v50  ;;  %vm757_vm4 = vweird.f32 %v3364_v41  ;;  %v2485_v50 = vld [vmem:[%s4004_s1 + $0xac] sm:$0xf0] }
 0x194   :  { %v709_v55 = vsub.f32 1.0, %v708_v47  ;;  %2579 = vpow2.f32 %v2031_v39  ;;  %v768_v62 = vmul.f32 %v3390_v53, %v3322_v10  ;;  %v2576_v14 = vpop.eup %2575  ;;  %v778_v39 = vand.u32 2147483648, %v3322_v10  ;;  %1069 = vmatpush.bf16.msra.mxu3 %v2074_v27 }
 0x195   :  { %2581 = vtanh.f32 %v682_v42  ;;  %v658_v0 = vpop.f32.mrf.mxu2  ;;  %v730_v45 = vsel %vm3468_vm14, %v3311_v6, %v726_v16  ;;  %vm773_vm15 = vweird.f32 %v3390_v53  ;;  %v2054_v6 = vor.u32 %v2434_v35, %v2053_v33  ;;  %1028 = vmatpush.bf16.msra.mxu0 %v2046_v44  ;;  %v2283_v44 = vld [vmem:[%s4004_s1 + $0xc0] sm:$0xf] }
 0x196   :  { %v710_v1 = vmul.f32 %v3362_v40, %v709_v55  ;;  %v681_v3 = vadd.f32 %v1899_v43, %v658_v0  ;;  %v769_v7 = vsub.f32 1.0, %v768_v62  ;;  %v761_v55 = vand.u32 2147483647, %v3364_v41  ;;  %vm3503_vm3 = vmor %vm772_vm2, %vm773_vm15  ;;  %v2035_v62 = vld [vmem:[%s4005_s0 + $0x80] sm:$0xff] }
 0x197   :  { %v735_v46 = vsel %vm732_vm1, %v3399_v34, %v730_v45  ;;  %v764_v4 = vor.u32 1.1754944e-38, %v763_v48  ;;  %1056 = vmatpush.bf16.msrb.mxu2 %v2054_v6  ;;  %v779_v34 = vor.u32 1.1754944e-38, %v778_v39  ;;  %v2493_v39 = vld [vmem:[%s4004_s1 + $0xec] sm:$0xf0]  ;;  %v2267_v48 = vld [vmem:[%s4004_s1 + $0xa0] sm:$0xf] }
 0x198   :  { %v711_v15 = vadd.f32 %v3362_v40, %v710_v1  ;;  %v2034_v17 = vmul.f32 -1.442695, %v681_v3  ;;  %v770_v23 = vmul.f32 %v3390_v53, %v769_v7  ;;  %vm762_vm6 = vcmp.eq.f32.partialorder %v761_v55, 8.507059e+37  ;;  %v2489_v45 = vld [vmem:[%s4004_s1 + $0xcc] sm:$0xf0] }
 0x199   :  { %v3433_v22 = vpop.eup %2577  ;;  %v799_v3 = vmul.f32 %v735_v46, %v3165_v26  ;;  %v2307_v55 = vld [vmem:[%s4004_s1 + $0xe8] sm:$0xf]  ;;  %v2309_v46 = vld [vmem:[%s4004_s1 + $0xf8] sm:$0xf0] }
 0x19a   :  { %v2580_v24 = vpop.eup %2579  ;;  %v753_v32 = vmul.f32 %v3433_v22, %v3364_v41  ;;  %2583 = vpow2.f32 %v2034_v17  ;;  %v715_v42 = vsel %vm3448_vm12, %v3362_v40, %v711_v15  ;;  %v2055_v40 = vld [vmem:[%s4004_s1 + $0x18] sm:$0xf0]  ;;  %v771_v51 = vadd.f32 %v3390_v53, %v770_v23 }
 0x19b   :  { %v2582_v36 = vpop.eup %2581  ;;  %v3476_v43 = vadd.f32 1.0, %v2580_v24  ;;  %v720_v52 = vsel %vm3452_vm13, %v719_v2, %v715_v42  ;;  %vm758_vm0 = vweird.f32 %v3433_v22  ;;  %v2058_v57 = vor.u32 %v2432_v60, %v2055_v40  ;;  %v2299_v42 = vld [vmem:[%s4004_s1 + $0xe0] sm:$0xf] }
 0x19c   :  { %v754_v47 = vsub.f32 1.0, %v753_v32  ;;  %v801_v37 = vmul.f32 %v2576_v14, %v720_v52  ;;  %vm759_vm5 = vmor %vm757_vm4, %vm758_vm0  ;;  %v775_v10 = vsel %vm3503_vm3, %v3390_v53, %v771_v51  ;;  %v2268_v60 = vor.u32 %v2485_v50, %v2267_v48  ;;  %v2251_v40 = vld [vmem:[%s4004_s1 + $0x80] sm:$0xf]  ;;  %v2481_v51 = vld [vmem:[%s4004_s1 + $0x8c] sm:$0xf0] }
 0x19d   :  { %2585 = vrcp.f32 %v3476_v43  ;;  %1070 = vmatpush.bf16.msra.mxu3 %v2058_v57  ;;  %v780_v41 = vsel %vm777_vm7, %v779_v34, %v775_v10  ;;  %v748_v11 = vand.u32 2147483648, %v3476_v43  ;;  %v746_v13 = vand.u32 2147483647, %v3476_v43  ;;  %v2491_v52 = vld [vmem:[%s4004_s1 + $0xe4] sm:$0xf] }
 0x19e   :  { %v755_v54 = vmul.f32 %v3433_v22, %v754_v47  ;;  %v3515_v7 = vadd.f32 %v801_v37, %v799_v3  ;;  %v800_v9 = vmul.f32 %v780_v41, %v3192_v49  ;;  %vm742_vm9 = vweird.f32 %v3476_v43  ;;  %v2494_v57 = vld [vmem:[%s4004_s1 + $0xf4] sm:$0xf0]  ;;  %v2235_v10 = vld [vmem:[%s4004_s1 + $0x60] sm:$0xf]  ;;  %v2487_v3 = vld [vmem:[%s4004_s1 + $0xc4] sm:$0xf] }
 0x19f   :  { %v749_v17 = vor.u32 1.1754944e-38, %v748_v11  ;;  %vm747_vm11 = vcmp.eq.f32.partialorder %v746_v13, 8.507059e+37  ;;  %v2284_v47 = vor.u32 %v2489_v45, %v2283_v44  ;;  %v2252_v6 = vor.u32 %v2481_v51, %v2251_v40  ;;  %v2291_v41 = vld [vmem:[%s4004_s1 + $0xc8] sm:$0xf]  ;;  %v2488_v11 = vld [vmem:[%s4004_s1 + $0xcc] sm:$0xf] }
 0x1a0   :  { %v2584_v58 = vpop.eup %2583  ;;  %v756_v0 = vadd.f32 %v3433_v22, %v755_v54  ;;  %v2301_v54 = vld [vmem:[%s4004_s1 + $0xf0] sm:$0xf0]  ;;  %v2308_v37 = vor.u32 %v2494_v57, %v2307_v55  ;;  %v2259_v44 = vld [vmem:[%s4004_s1 + $0x88] sm:$0xf]  ;;  %v2482_v50 = vld [vmem:[%s4004_s1 + $0x94] sm:$0xf0] }
 0x1a1   :  { %v706_v21 = vadd.f32 1.0, %v2584_v58  ;;  %v2304_v56 = vor.u32 %v2491_v52, %v2301_v54  ;;  %v2492_v58 = vld [vmem:[%s4004_s1 + $0xec] sm:$0xf]  ;;  %v2261_v40 = vld [vmem:[%s4004_s1 + $0x98] sm:$0xf0] }
 0x1a2   :  { %v760_v59 = vsel %vm759_vm5, %v3433_v22, %v756_v0  ;;  %v2036_v0 = vld [vmem:[%s4005_s0 + $0x88] sm:$0xff]  ;;  %1451 = vmatpush.bf16.msra.mxu2 %v2308_v37 }
 0x1a3   :  { %v2586_v1 = vpop.eup %2585  ;;  %v765_v5 = vsel %vm762_vm6, %v764_v4, %v760_v59  ;;  %2587 = vrcp.f32 %v706_v21  ;;  %v793_v49 = vand.u32 2147483648, %v706_v21  ;;  %v791_v23 = vand.u32 2147483647, %v706_v21  ;;  %1437 = vmatpush.bf16.msra.mxu1 %v2304_v56  ;;  %v2187_v56 = vld [vmem:[%s4004_s1] sm:$0xf] }
 0x1a4   :  { %v738_v63 = vmul.f32 %v2586_v1, %v3476_v43  ;;  %v802_v8 = vmul.f32 %v2582_v36, %v765_v5  ;;  %vm743_vm8 = vweird.f32 %v2586_v1  ;;  %2589 = vtanh.f32 %v3515_v7  ;;  %v2285_v5 = vld [vmem:[%s4004_s1 + $0xd0] sm:$0xf0] }
 0x1a5   :  { %vm744_vm10 = vmor %vm742_vm9, %vm743_vm8  ;;  %vm787_vm13 = vweird.f32 %v706_v21  ;;  %v794_v29 = vor.u32 1.1754944e-38, %v793_v49  ;;  %vm792_vm15 = vcmp.eq.f32.partialorder %v791_v23, 8.507059e+37  ;;  %v2300_v43 = vor.u32 %v2493_v39, %v2299_v42  ;;  %v2483_v49 = vld [vmem:[%s4004_s1 + $0xa4] sm:$0xf] }
 0x1a6   :  { %v739_v53 = vsub.f32 1.0, %v738_v63  ;;  %v3521_v26 = vadd.f32 %v802_v8, %v800_v9  ;;  %v2312_v4 = vor.u32 %v2492_v58, %v2309_v46  ;;  %v2490_v9 = vld [vmem:[%s4004_s1 + $0xd4] sm:$0xf0]  ;;  %v2479_v39 = vld [vmem:[%s4004_s1 + $0x84] sm:$0xf] }
 0x1a7   :  { %1423 = vmatpush.bf16.msrb.mxu0 %v2300_v43  ;;  %v2292_v13 = vor.u32 %v2490_v9, %v2291_v41  ;;  %v2253_v43 = vld [vmem:[%s4004_s1 + $0x90] sm:$0xf0]  ;;  %v2476_v41 = vld [vmem:[%s4004_s1 + $0x6c] sm:$0xf]  ;;  %v2471_v9 = vld [vmem:[%s4004_s1 + $0x44] sm:$0xf] }
 0x1a8   :  { %v740_v12 = vmul.f32 %v2586_v1, %v739_v53  ;;  %2591 = vtanh.f32 %v3521_v26  ;;  %1465 = vmatpush.bf16.msrb.mxu3 %v2312_v4  ;;  %v2288_v53 = vor.u32 %v2487_v3, %v2285_v5  ;;  %v2256_v48 = vor.u32 %v2479_v39, %v2253_v43  ;;  %v2041_v4 = vld [vmem:[%s4005_s0 + $0xb0] sm:$0xff]  ;;  %v2243_v3 = vld [vmem:[%s4004_s1 + $0x68] sm:$0xf]  ;;  %v2478_v5 = vld [vmem:[%s4004_s1 + $0x74] sm:$0xf0] }
 0x1a9   :  { %v2588_v14 = vpop.eup %2587  ;;  %1452 = vmatpush.bf16.msra.mxu2 %v2292_v13  ;;  %v2227_v13 = vld [vmem:[%s4004_s1 + $0x48] sm:$0xf]  ;;  %v2042_v43 = vld [vmem:[%s4005_s0 + $0xb8] sm:$0xff] }
 0x1aa   :  { %v783_v15 = vmul.f32 %v2588_v14, %v706_v21  ;;  %v741_v16 = vadd.f32 %v2586_v1, %v740_v12  ;;  %vm788_vm12 = vweird.f32 %v2588_v14  ;;  %v2590_v25 = vpop.eup %2589  ;;  %v2477_v21 = vld [vmem:[%s4004_s1 + $0x6c] sm:$0xf0]  ;;  %v2293_v12 = vld [vmem:[%s4004_s1 + $0xd8] sm:$0xf0]  ;;  %1438 = vmatpush.bf16.msra.mxu1 %v2288_v53 }
 0x1ab   :  { %vm789_vm14 = vmor %vm787_vm13, %vm788_vm12  ;;  %1424 = vmatpush.bf16.msrb.mxu0 %v2284_v47  ;;  %v2245_v53 = vld [vmem:[%s4004_s1 + $0x78] sm:$0xf0] }
 0x1ac   :  { %v784_v18 = vsub.f32 1.0, %v783_v15  ;;  %v745_v19 = vsel %vm744_vm10, %v2586_v1, %v741_v16  ;;  %v2236_v1 = vor.u32 %v2477_v21, %v2235_v10  ;;  %v2506_v21 = vld [vmem:[%s4006_s2 + $0x38] sm:$0xff] }
 0x1ad   :  { %v750_v20 = vsel %vm747_vm11, %v749_v17, %v745_v19  ;;  %v2037_v17 = vld [vmem:[%s4005_s0 + $0x90] sm:$0xff] }
 0x1ae   :  { %v785_v22 = vmul.f32 %v2588_v14, %v784_v18  ;;  %v807_v28 = vmul.f32 %v2590_v25, %v750_v20  ;;  %v2592_v24 = vpop.eup %2591  ;;  %v2219_v18 = vld [vmem:[%s4004_s1 + $0x40] sm:$0xf]  ;;  %v2473_v19 = vld [vmem:[%s4004_s1 + $0x4c] sm:$0xf0]  ;;  %v2269_v20 = vld [vmem:[%s4004_s1 + $0xb0] sm:$0xf0] }
 0x1af   :  { %1425 = vmatpush.bf16.msrb.mxu0 %v2268_v60  ;;  %v2272_v23 = vor.u32 %v2483_v49, %v2269_v20  ;;  %v2275_v25 = vld [vmem:[%s4004_s1 + $0xa8] sm:$0xf]  ;;  %v2480_v60 = vld [vmem:[%s4004_s1 + $0x8c] sm:$0xf] }
 0x1b0   :  { %v786_v27 = vadd.f32 %v2588_v14, %v785_v22  ;;  %v809_v2 = vpack.c.bf16 %v807_v28, %v807_v28  ;;  %v2220_v22 = vor.u32 %v2473_v19, %v2219_v18  ;;  %v2264_v52 = vor.u32 %v2480_v60, %v2261_v40  ;;  %v2474_v19 = vld [vmem:[%s4004_s1 + $0x54] sm:$0xf0]  ;;  %v2472_v49 = vld [vmem:[%s4004_s1 + $0x4c] sm:$0xf] }
 0x1b1   :  { %1439 = vmatpush.bf16.msra.mxu1 %v2272_v23  ;;  %v2248_v18 = vor.u32 %v2476_v41, %v2245_v53  ;;  %v2470_v60 = vld [vmem:[%s4004_s1 + $0x34] sm:$0xf0] }
 0x1b2   :  { %v790_v30 = vsel %vm789_vm14, %v2588_v14, %v786_v27  ;;  %v857_v35 = vunpack.c.l.b16 %v809_v2  ;;  %v2296_v14 = vor.u32 %v2488_v11, %v2293_v12  ;;  %v2486_v27 = vld [vmem:[%s4004_s1 + $0xb4] sm:$0xf0]  ;;  %v2221_v12 = vld [vmem:[%s4004_s1 + $0x50] sm:$0xf0] }
 0x1b3   :  { %v795_v61 = vsel %vm792_vm15, %v794_v29, %v790_v30  ;;  %1426 = vmatpush.bf16.msrb.mxu0 %v2252_v6  ;;  %v2039_v29 = vld [vmem:[%s4005_s0 + $0xa0] sm:$0xff]  ;;  %v2040_v30 = vld [vmem:[%s4005_s0 + $0xa8] sm:$0xff]  ;;  %v2260_v6 = vor.u32 %v2482_v50, %v2259_v44 }
 0x1b4   :  { %v808_v31 = vmul.f32 %v2592_v24, %v795_v61  ;;  %1466 = vmatpush.bf16.msrb.mxu3 %v2296_v14  ;;  %v2276_v24 = vor.u32 %v2486_v27, %v2275_v25  ;;  %v2277_v61 = vld [vmem:[%s4004_s1 + $0xb8] sm:$0xf0]  ;;  %v2505_v14 = vld [vmem:[%s4006_s2 + $0x30] sm:$0xff]  ;;  %v2224_v25 = vor.u32 %v2471_v9, %v2221_v12  ;;  %v2211_v50 = vld [vmem:[%s4004_s1 + $0x28] sm:$0xf] }
 0x1b5   :  { %1440 = vmatpush.bf16.msra.mxu1 %v2256_v48  ;;  %v2229_v27 = vld [vmem:[%s4004_s1 + $0x58] sm:$0xf0]  ;;  %v2195_v12 = vld [vmem:[%s4004_s1 + $0x8] sm:$0xf] }
 0x1b6   :  { %v810_v32 = vpack.c.bf16 %v808_v31, %v808_v31  ;;  %v2515_v33 = vpack.c.bf16 %v808_v31, %v807_v28  ;;  %v2484_v28 = vld [vmem:[%s4004_s1 + $0xac] sm:$0xf]  ;;  %1453 = vmatpush.bf16.msra.mxu2 %v2276_v24  ;;  %v2232_v24 = vor.u32 %v2472_v49, %v2229_v27 }
 0x1b7   :  { %1427 = vmatpush.bf16.msrb.mxu0 %v2236_v1  ;;  %v2280_v2 = vor.u32 %v2484_v28, %v2277_v61  ;;  %v2464_v27 = vld [vmem:[%s4004_s1 + $0xc] sm:$0xf] }
 0x1b8   :  { %2516 = vst [vmem:[#allocation2] sm:$0xff] %v2515_v33   ;;  %v858_v36 = vunpack.c.l.b16 %v810_v32  ;;  %v2203_v32 = vld [vmem:[%s4004_s1 + $0x20] sm:$0xf]  ;;  %v2469_v33 = vld [vmem:[%s4004_s1 + $0x2c] sm:$0xf0] }
 0x1b9   :  { %v2204_v42 = vor.u32 %v2469_v33, %v2203_v32  ;;  %1467 = vmatpush.bf16.msrb.mxu3 %v2280_v2  ;;  %v2467_v2 = vld [vmem:[%s4004_s1 + $0x24] sm:$0xf]  ;;  %v2205_v32 = vld [vmem:[%s4004_s1 + $0x30] sm:$0xf0]  ;;  %v2504_v33 = vld [vmem:[%s4006_s2 + $0x28] sm:$0xff] }
 0x1ba   :  { %v859_v38 = vpack.c.b16 %v858_v36, %v857_v35  ;;  %1454 = vmatpush.bf16.msra.mxu2 %v2260_v6  ;;  %v2208_v48 = vor.u32 %v2467_v2, %v2205_v32  ;;  %v2503_v6 = vld [vmem:[%s4006_s2 + $0x20] sm:$0xff] }
 0x1bb   :  { %1428 = vmatpush.bf16.msrb.mxu0 %v2220_v22 }
 0x1bc   :  { %1029 = vmatmul.bf16.vlgmr.msra.gmra.mxu0 %v859_v38  ;;  %1043 = vmatmul.bf16.vlgmr.msrb.gmra.mxu1 %v859_v38 }
 0x1bd   :  { %1057 = vmatmul.bf16.vlgmr.msrb.gmra.mxu2 %v859_v38  ;;  %1071 = vmatmul.bf16.vlgmr.msra.gmra.mxu3 %v859_v38 }
 0x1be   :  { %1468 = vmatpush.bf16.msrb.mxu3 %v2264_v52 }
 0x1bf   :  { %1429 = vmatpush.bf16.msrb.mxu0 %v2204_v42 }
 0x1c2   :  { %1469 = vmatpush.bf16.msrb.mxu3 %v2248_v18 }
 0x1c6   :  { %1470 = vmatpush.bf16.msrb.mxu3 %v2232_v24 }
 0x239   :  { %v1030_v34 = vpop.f32.mrf.mxu0  ;;  %v1044_v59 = vpop.f32.mrf.mxu1 }
 0x23a   :  { %v1077_v63 = vadd.f32 %v2035_v62, %v1030_v34  ;;  %v1078_v8 = vadd.f32 %v2036_v0, %v1044_v59  ;;  %v2465_v62 = vld [vmem:[%s4004_s1 + $0xc] sm:$0xf0]  ;;  %v2475_v34 = vld [vmem:[%s4004_s1 + $0x64] sm:$0xf]  ;;  %v2237_v59 = vld [vmem:[%s4004_s1 + $0x70] sm:$0xf0] }
 0x23b   :  { %v2188_v10 = vor.u32 %v2465_v62, %v2187_v56  ;;  %v2240_v11 = vor.u32 %v2475_v34, %v2237_v59  ;;  %v2468_v59 = vld [vmem:[%s4004_s1 + $0x2c] sm:$0xf] }
 0x23c   :  { %v2171_v15 = vmul.f32 -1.442695, %v1077_v63  ;;  %v2172_v16 = vmul.f32 -1.442695, %v1078_v8  ;;  %v2038_v63 = vld [vmem:[%s4005_s0 + $0x98] sm:$0xff] }
 0x23d   :  { %1430 = vmatpush.bf16.msrb.mxu0 %v2188_v10  ;;  %1441 = vmatpush.bf16.msra.mxu1 %v2240_v11  ;;  %v2189_v11 = vld [vmem:[%s4004_s1 + $0x10] sm:$0xf0] }
 0x23e   :  { %2593 = vpow2.f32 %v2171_v15 }
 0x23f   :  { %2595 = vpow2.f32 %v2172_v16 }
 0x240   :  { %v1058_v31 = vpop.f32.mrf.mxu2  ;;  %v1072_v37 = vpop.f32.mrf.mxu3 }
 0x241   :  { %v1079_v35 = vadd.f32 %v2037_v17, %v1058_v31  ;;  %v1032_v36 = vpop.f32.mrf.mxu0  ;;  %v1046_v38 = vpop.f32.mrf.mxu1  ;;  %1718 = vmatpush.bf16.msra.mxu0 %v2506_v21  ;;  %v2244_v17 = vor.u32 %v2478_v5, %v2243_v3  ;;  %v1080_v23 = vadd.f32 %v2038_v63, %v1072_v37  ;;  %1442 = vmatpush.bf16.msra.mxu1 %v2224_v25  ;;  %v2213_v63 = vld [vmem:[%s4004_s1 + $0x38] sm:$0xf0] }
 0x242   :  { %v1081_v45 = vadd.f32 %v2039_v29, %v1032_v36  ;;  %v1082_v47 = vadd.f32 %v2040_v30, %v1046_v38  ;;  %v2228_v30 = vor.u32 %v2474_v19, %v2227_v13  ;;  %v2212_v37 = vor.u32 %v2470_v60, %v2211_v50  ;;  %v2502_v13 = vld [vmem:[%s4006_s2 + $0x18] sm:$0xff]  ;;  %v2500_v50 = vld [vmem:[%s4006_s2 + $0x8] sm:$0xff] }
 0x243   :  { %v2173_v51 = vmul.f32 -1.442695, %v1079_v35  ;;  %1455 = vmatpush.bf16.msra.mxu2 %v2244_v17  ;;  %v2466_v19 = vld [vmem:[%s4004_s1 + $0x14] sm:$0xf0]  ;;  %v2216_v24 = vor.u32 %v2468_v59, %v2213_v63 }
 0x244   :  { %v2594_v54 = vpop.eup %2593  ;;  %v2174_v55 = vmul.f32 -1.442695, %v1081_v45  ;;  %v2175_v46 = vmul.f32 -1.442695, %v1082_v47  ;;  %v2196_v32 = vor.u32 %v2466_v19, %v2195_v12 }
 0x245   :  { %v2596_v57 = vpop.eup %2595  ;;  %v3657_v58 = vadd.f32 1.0, %v2594_v54  ;;  %2597 = vpow2.f32 %v2173_v51  ;;  %1719 = vmatpush.bf16.msra.mxu0 %v2505_v14  ;;  %1443 = vmatpush.bf16.msra.mxu1 %v2208_v48 }
 0x246   :  { %v3662_v0 = vadd.f32 1.0, %v2596_v57  ;;  %2599 = vpow2.f32 %v2174_v55  ;;  %1471 = vmatpush.bf16.msrb.mxu3 %v2216_v24  ;;  %v2182_v24 = vld [vmem:[%s4005_s0 + $0xe8] sm:$0xff] }
 0x247   :  { %2601 = vrcp.f32 %v3657_v58  ;;  %v1118_v42 = vand.u32 2147483647, %v3657_v58  ;;  %vm1114_vm0 = vweird.f32 %v3657_v58  ;;  %v1120_v47 = vand.u32 2147483648, %v3657_v58  ;;  %1456 = vmatpush.bf16.msra.mxu2 %v2228_v30 }
 0x248   :  { %2603 = vrcp.f32 %v3662_v0  ;;  %v1060_v1 = vpop.f32.mrf.mxu2  ;;  %v1074_v44 = vpop.f32.mrf.mxu3  ;;  %v1135_v40 = vand.u32 2147483648, %v3662_v0  ;;  %v1133_v55 = vand.u32 2147483647, %v3662_v0  ;;  %vm1129_vm3 = vweird.f32 %v3662_v0 }
 0x249   :  { %2605 = vpow2.f32 %v2175_v46  ;;  %v1083_v8 = vadd.f32 %v2041_v4, %v1060_v1  ;;  %1720 = vmatpush.bf16.msra.mxu0 %v2504_v33  ;;  %v1084_v56 = vadd.f32 %v2042_v43, %v1074_v44  ;;  %vm1119_vm5 = vcmp.eq.f32.partialorder %v1118_v42, 8.507059e+37 }
 0x24a   :  { %vm1134_vm7 = vcmp.eq.f32.partialorder %v1133_v55, 8.507059e+37 }
 0x24b   :  { %v2598_v15 = vpop.eup %2597  ;;  %v2176_v16 = vmul.f32 -1.442695, %v1083_v8  ;;  %1457 = vmatpush.bf16.msra.mxu2 %v2212_v37  ;;  %v2463_v8 = vld [vmem:[%s4004_s1 + $0x4] sm:$0xf] }
 0x24c   :  { %v2600_v20 = vpop.eup %2599  ;;  %v3711_v22 = vadd.f32 1.0, %v2598_v15 }
 0x24d   :  { %v3716_v28 = vpop.eup %2601  ;;  %v3718_v29 = vadd.f32 1.0, %v2600_v20  ;;  %2607 = vpow2.f32 %v2176_v16  ;;  %1721 = vmatpush.bf16.msra.mxu0 %v2503_v6 }
 0x24e   :  { %v3720_v61 = vpop.eup %2603  ;;  %v1110_v31 = vmul.f32 %v3716_v28, %v3657_v58  ;;  %2609 = vrcp.f32 %v3711_v22  ;;  %vm1115_vm1 = vweird.f32 %v3716_v28  ;;  %v1136_v58 = vor.u32 1.1754944e-38, %v1135_v40 }
 0x24f   :  { %v2606_v35 = vpop.eup %2605  ;;  %v1125_v36 = vmul.f32 %v3720_v61, %v3662_v0  ;;  %2611 = vrcp.f32 %v3718_v29  ;;  %vm1130_vm2 = vweird.f32 %v3720_v61  ;;  %vm3775_vm4 = vmor %vm1114_vm0, %vm1115_vm1  ;;  %v1121_v0 = vor.u32 1.1754944e-38, %v1120_v47  ;;  %1458 = vmatpush.bf16.msra.mxu2 %v2196_v32 }
 0x250   :  { %v1111_v38 = vsub.f32 1.0, %v1110_v31  ;;  %2613 = vtanh.f32 %v1080_v23  ;;  %v3738_v39 = vadd.f32 1.0, %v2606_v35  ;;  %vm3785_vm6 = vmor %vm1129_vm3, %vm1130_vm2  ;;  %v1163_v17 = vand.u32 2147483647, %v3718_v29 }
 0x251   :  { %v1126_v45 = vsub.f32 1.0, %v1125_v36  ;;  %v1165_v18 = vand.u32 2147483648, %v3718_v29  ;;  %1722 = vmatpush.bf16.msra.mxu0 %v2502_v13  ;;  %vm1159_vm9 = vweird.f32 %v3718_v29  ;;  %v1150_v37 = vand.u32 2147483648, %v3711_v22 }
 0x252   :  { %v1112_v51 = vmul.f32 %v3716_v28, %v1111_v38  ;;  %2615 = vrcp.f32 %v3738_v39  ;;  %v1180_v2 = vand.u32 2147483648, %v3738_v39  ;;  %v1178_v38 = vand.u32 2147483647, %v3738_v39 }
 0x253   :  { %v2608_v52 = vpop.eup %2607  ;;  %v1127_v54 = vmul.f32 %v3720_v61, %v1126_v45  ;;  %v1166_v36 = vor.u32 1.1754944e-38, %v1165_v18  ;;  %vm1164_vm12 = vcmp.eq.f32.partialorder %v1163_v17, 8.507059e+37  ;;  %vm1174_vm13 = vweird.f32 %v3738_v39  ;;  %v2177_v17 = vld [vmem:[%s4005_s0 + $0xc0] sm:$0xff]  ;;  %v2178_v18 = vld [vmem:[%s4005_s0 + $0xc8] sm:$0xff] }
 0x254   :  { %v3761_v57 = vpop.eup %2609  ;;  %v1113_v46 = vadd.f32 %v3716_v28, %v1112_v51  ;;  %v3765_v62 = vadd.f32 1.0, %v2608_v52  ;;  %v1181_v6 = vor.u32 1.1754944e-38, %v1180_v2  ;;  %vm1179_vm15 = vcmp.eq.f32.partialorder %v1178_v38, 8.507059e+37 }
 0x255   :  { %v3767_v4 = vpop.eup %2611  ;;  %v1140_v10 = vmul.f32 %v3761_v57, %v3711_v22  ;;  %v1128_v34 = vadd.f32 %v3720_v61, %v1127_v54  ;;  %vm1145_vm0 = vweird.f32 %v3761_v57  ;;  %vm1144_vm1 = vweird.f32 %v3711_v22 }
 0x256   :  { %v2614_v1 = vpop.eup %2613  ;;  %v1117_v5 = vsel %vm3775_vm4, %v3716_v28, %v1113_v46  ;;  %v1155_v41 = vmul.f32 %v3767_v4, %v3718_v29  ;;  %2617 = vrcp.f32 %v3765_v62  ;;  %v2197_v28 = vld [vmem:[%s4004_s1 + $0x18] sm:$0xf0]  ;;  %vm1160_vm8 = vweird.f32 %v3767_v4  ;;  %vm1146_vm2 = vmor %vm1144_vm1, %vm1145_vm0 }
 0x257   :  { %v1122_v53 = vsel %vm1119_vm5, %v1121_v0, %v1117_v5  ;;  %v1132_v9 = vsel %vm3785_vm6, %v3720_v61, %v1128_v34  ;;  %2619 = vtanh.f32 %v1084_v56  ;;  %v1141_v49 = vsub.f32 1.0, %v1140_v10  ;;  %vm1161_vm11 = vmor %vm1159_vm9, %vm1160_vm8 }
 0x258   :  { %v2616_v14 = vpop.eup %2615  ;;  %v1137_v15 = vsel %vm1134_vm7, %v1136_v58, %v1132_v9  ;;  %v1156_v16 = vsub.f32 1.0, %v1155_v41  ;;  %v1203_v23 = vmul.f32 %v2614_v1, %v1122_v53  ;;  %v2192_v61 = vor.u32 %v2463_v8, %v2189_v11 }
 0x259   :  { %v1201_v20 = vmul.f32 %v1137_v15, %v3515_v7  ;;  %v1170_v25 = vmul.f32 %v2616_v14, %v3738_v39  ;;  %v2501_v7 = vld [vmem:[%s4006_s2 + $0x10] sm:$0xff]  ;;  %v2200_v42 = vor.u32 %v2464_v27, %v2197_v28  ;;  %vm1175_vm10 = vweird.f32 %v2616_v14  ;;  %v2499_v39 = vld [vmem:[%s4006_s2] sm:$0xff] }
 0x25a   :  { %v1157_v30 = vmul.f32 %v3767_v4, %v1156_v16  ;;  %1444 = vmatpush.bf16.msra.mxu1 %v2192_v61  ;;  %v1142_v29 = vmul.f32 %v3761_v57, %v1141_v49  ;;  %1723 = vmatpush.bf16.msra.mxu0 %v2501_v7  ;;  %vm1176_vm14 = vmor %vm1174_vm13, %vm1175_vm10  ;;  %v1148_v10 = vand.u32 2147483647, %v3711_v22  ;;  %v1151_v1 = vor.u32 1.1754944e-38, %v1150_v37  ;;  %v2496_v15 = vld [vmem:[#allocation2] sm:$0xff]  ;;  %v2179_v28 = vld [vmem:[%s4005_s0 + $0xd0] sm:$0xff] }
 0x25b   :  { %v1171_v31 = vsub.f32 1.0, %v1170_v25  ;;  %v3835_v44 = vadd.f32 %v1203_v23, %v1201_v20  ;;  %1472 = vmatpush.bf16.msrb.mxu3 %v2200_v42  ;;  %v1195_v3 = vand.u32 2147483648, %v3765_v62  ;;  %vm1189_vm4 = vweird.f32 %v3765_v62 }
 0x25c   :  { %v2618_v33 = vpop.eup %2617  ;;  %v1158_v35 = vadd.f32 %v3767_v4, %v1157_v30  ;;  %v1143_v46 = vadd.f32 %v3761_v57, %v1142_v29  ;;  %vm1149_vm5 = vcmp.eq.f32.partialorder %v1148_v10, 8.507059e+37  ;;  %v2181_v30 = vld [vmem:[%s4005_s0 + $0xe0] sm:$0xff]  ;;  %v2183_v29 = vld [vmem:[%s4005_s0 + $0xf0] sm:$0xff]  ;;  %v2180_v10 = vld [vmem:[%s4005_s0 + $0xd8] sm:$0xff] }
 0x25d   :  { %v2620_v43 = vpop.eup %2619  ;;  %v1172_v45 = vmul.f32 %v2616_v14, %v1171_v31  ;;  %v1185_v47 = vmul.f32 %v2618_v33, %v3765_v62  ;;  %2621 = vtanh.f32 %v3835_v44  ;;  %vm1190_vm3 = vweird.f32 %v2618_v33 }
 0x25e   :  { %v1162_v48 = vsel %vm1161_vm11, %v3767_v4, %v1158_v35  ;;  %1724 = vmatpush.bf16.msra.mxu0 %v2500_v50  ;;  %v1147_v0 = vsel %vm1146_vm2, %v3761_v57, %v1143_v46  ;;  %vm1191_vm6 = vmor %vm1189_vm4, %vm1190_vm3  ;;  %v1196_v41 = vor.u32 1.1754944e-38, %v1195_v3 }
 0x25f   :  { %v1186_v60 = vsub.f32 1.0, %v1185_v47  ;;  %v1167_v40 = vsel %vm1164_vm12, %v1166_v36, %v1162_v48  ;;  %v1173_v51 = vadd.f32 %v2616_v14, %v1172_v45  ;;  %v1152_v22 = vsel %vm1149_vm5, %v1151_v1, %v1147_v0  ;;  %v3888_v48 = vld [vmem:[%s4007_s3] ss:$0 sm:$0xff] }
 0x260   :  { %v1204_v54 = vmul.f32 %v2620_v43, %v1167_v40 }
 0x261   :  { %v1177_v52 = vsel %vm1176_vm14, %v2616_v14, %v1173_v51  ;;  %v1187_v55 = vmul.f32 %v2618_v33, %v1186_v60 }
 0x262   :  { %v1182_v56 = vsel %vm1179_vm15, %v1181_v6, %v1177_v52  ;;  %1725 = vmatpush.bf16.msra.mxu0 %v2499_v39 }
 0x263   :  { %v1202_v4 = vmul.f32 %v1182_v56, %v3521_v26  ;;  %v1188_v34 = vadd.f32 %v2618_v33, %v1187_v55  ;;  %v2622_v59 = vpop.eup %2621  ;;  %v1193_v26 = vand.u32 2147483647, %v3765_v62  ;;  %v2495_v62 = vld [vmem:[#allocation2 + $0x10] sm:$0xff] }
 0x264   :  { %v1209_v5 = vmul.f32 %v2622_v59, %v1152_v22 }
 0x265   :  { %v3856_v21 = vadd.f32 %v1204_v54, %v1202_v4  ;;  %v1192_v58 = vsel %vm1191_vm6, %v2618_v33, %v1188_v34  ;;  %vm1194_vm7 = vcmp.eq.f32.partialorder %v1193_v26, 8.507059e+37 }
 0x266   :  { %v1197_v63 = vsel %vm1194_vm7, %v1196_v41, %v1192_v58  ;;  %v1211_v53 = vpack.c.bf16 %v1209_v5, %v1209_v5 }
 0x267   :  { %2623 = vtanh.f32 %v3856_v21 }
 0x268   :  { %v1259_v12 = vunpack.c.l.b16 %v1211_v53 }
 0x26d   :  { %v2624_v57 = vpop.eup %2623 }
 0x26e   :  { %v1210_v8 = vmul.f32 %v2624_v57, %v1197_v63 }
 0x270   :  { %v1212_v9 = vpack.c.bf16 %v1210_v8, %v1210_v8  ;;  %v2520_v11 = vpack.c.bf16 %v1210_v8, %v1209_v5  ;;  %v2184_v8 = vld [vmem:[%s4005_s0 + $0xf8] sm:$0xff] }
 0x272   :  { %2521 = vst [vmem:[#allocation2 + $0x18] sm:$0xff] %v2520_v11   ;;  %v1260_v13 = vunpack.c.l.b16 %v1212_v9 }
 0x274   :  { %v1261_v14 = vpack.c.b16 %v1260_v13, %v1259_v12 }
 0x276   :  { %1431 = vmatmul.bf16.vlgmr.msrb.gmra.mxu0 %v1261_v14  ;;  %1445 = vmatmul.bf16.vlgmr.msra.gmra.mxu1 %v1261_v14 }
 0x277   :  { %1459 = vmatmul.bf16.vlgmr.msra.gmra.mxu2 %v1261_v14  ;;  %1473 = vmatmul.bf16.vlgmr.msrb.gmra.mxu3 %v1261_v14 }
 0x279   :  { %v2497_v16 = vld [vmem:[#allocation2 + $0x18] sm:$0xff] }
 0x286   :  { %1726 = vmatmul.bf16.vlgmr.msra.gmra.mxu0 %v2495_v62 }
 0x296   :  { %1731 = vmatmul.bf16.gmra.mxu0 %v2496_v15 }
 0x2a6   :  { %1736 = vmatmul.bf16.gmra.mxu0 %v2497_v16 }
 0x2f3   :  { %v1432_v19 = vpop.f32.mrf.mxu0  ;;  %v1446_v49 = vpop.f32.mrf.mxu1 }
 0x2f4   :  { %v1479_v20 = vadd.f32 %v2177_v17, %v1432_v19  ;;  %v1480_v23 = vadd.f32 %v2178_v18, %v1446_v49 }
 0x2f6   :  { %v2313_v25 = vmul.f32 -1.442695, %v1479_v20  ;;  %v2314_v27 = vmul.f32 -1.442695, %v1480_v23 }
 0x2f8   :  { %2625 = vpow2.f32 %v2313_v25 }
 0x2f9   :  { %2627 = vpow2.f32 %v2314_v27 }
 0x2fa   :  { %v1460_v61 = vpop.f32.mrf.mxu2  ;;  %v1474_v60 = vpop.f32.mrf.mxu3 }
 0x2fb   :  { %v1481_v7 = vadd.f32 %v2179_v28, %v1460_v61  ;;  %v1434_v31 = vpop.f32.mrf.mxu0  ;;  %v1448_v2 = vpop.f32.mrf.mxu1  ;;  %v1482_v26 = vadd.f32 %v2180_v10, %v1474_v60 }
 0x2fc   :  { %v1483_v32 = vadd.f32 %v2181_v30, %v1434_v31  ;;  %v1484_v33 = vadd.f32 %v2182_v24, %v1448_v2 }
 0x2fd   :  { %v2315_v35 = vmul.f32 -1.442695, %v1481_v7 }
 0x2fe   :  { %v2626_v36 = vpop.eup %2625  ;;  %v2316_v38 = vmul.f32 -1.442695, %v1483_v32  ;;  %v2317_v45 = vmul.f32 -1.442695, %v1484_v33 }
 0x2ff   :  { %v2628_v42 = vpop.eup %2627  ;;  %v3878_v43 = vadd.f32 1.0, %v2626_v36  ;;  %2629 = vpow2.f32 %v2315_v35 }
 0x300   :  { %v3880_v47 = vadd.f32 1.0, %v2628_v42  ;;  %2631 = vpow2.f32 %v2316_v38 }
 0x301   :  { %2633 = vrcp.f32 %v3878_v43  ;;  %vm1516_vm8 = vweird.f32 %v3878_v43  ;;  %v1520_v57 = vand.u32 2147483647, %v3878_v43  ;;  %v1522_v63 = vand.u32 2147483648, %v3878_v43 }
 0x302   :  { %2635 = vrcp.f32 %v3880_v47  ;;  %v1462_v50 = vpop.f32.mrf.mxu2  ;;  %v1476_v53 = vpop.f32.mrf.mxu3  ;;  %v1537_v9 = vand.u32 2147483648, %v3880_v47  ;;  %vm1531_vm11 = vweird.f32 %v3880_v47  ;;  %v1535_v16 = vand.u32 2147483647, %v3880_v47 }
 0x303   :  { %2637 = vpow2.f32 %v2317_v45  ;;  %v1485_v40 = vadd.f32 %v2183_v29, %v1462_v50  ;;  %v1727_v51 = vpop.f32.mrf.mxu0  ;;  %v1486_v49 = vadd.f32 %v2184_v8, %v1476_v53  ;;  %v1523_v20 = vor.u32 1.1754944e-38, %v1522_v63 }
 0x304   :  { %v1728_v6 = vadd.f32 %v3888_v48, %v1727_v51  ;;  %v1538_v28 = vor.u32 1.1754944e-38, %v1537_v9  ;;  %vm1521_vm14 = vcmp.eq.f32.partialorder %v1520_v57, 8.507059e+37  ;;  %vm1536_vm15 = vcmp.eq.f32.partialorder %v1535_v16, 8.507059e+37 }
 0x305   :  { %v2630_v52 = vpop.eup %2629  ;;  %v2318_v54 = vmul.f32 -1.442695, %v1485_v40 }
 0x306   :  { %v2632_v55 = vpop.eup %2631  ;;  %v3893_v56 = vadd.f32 1.0, %v2630_v52  ;;  %1747 = vst [vmem:[%s4008_s4] sm:$0xff] %v1728_v6 }
 0x307   :  { %v2634_v46 = vpop.eup %2633  ;;  %v3898_v39 = vadd.f32 1.0, %v2632_v55  ;;  %2639 = vpow2.f32 %v2318_v54 }
 0x308   :  { %v2636_v37 = vpop.eup %2635  ;;  %v1512_v4 = vmul.f32 %v2634_v46, %v3878_v43  ;;  %2641 = vrcp.f32 %v3893_v56  ;;  %vm1517_vm9 = vweird.f32 %v2634_v46  ;;  %v1552_v57 = vand.u32 2147483648, %v3893_v56 }
 0x309   :  { %v2638_v0 = vpop.eup %2637  ;;  %v1527_v34 = vmul.f32 %v2636_v37, %v3880_v47  ;;  %2643 = vrcp.f32 %v3898_v39  ;;  %vm1532_vm10 = vweird.f32 %v2636_v37  ;;  %vm3926_vm12 = vmor %vm1516_vm8, %vm1517_vm9  ;;  %v1565_v33 = vand.u32 2147483647, %v3898_v39 }
 0x30a   :  { %v1513_v59 = vsub.f32 1.0, %v1512_v4  ;;  %v3907_v1 = vadd.f32 1.0, %v2638_v0  ;;  %vm3932_vm13 = vmor %vm1531_vm11, %vm1532_vm10  ;;  %v1567_v42 = vand.u32 2147483648, %v3898_v39  ;;  %vm1561_vm2 = vweird.f32 %v3898_v39 }
 0x30b   :  { %v1528_v3 = vsub.f32 1.0, %v1527_v34  ;;  %v1729_v22 = vpop.f32.mrf.mxu0  ;;  %vm1566_vm6 = vcmp.eq.f32.partialorder %v1565_v33, 8.507059e+37  ;;  %vm1546_vm10 = vweird.f32 %v3893_v56  ;;  %v1550_v8 = vand.u32 2147483647, %v3893_v56 }
 0x30c   :  { %v1514_v58 = vmul.f32 %v2634_v46, %v1513_v59  ;;  %2645 = vrcp.f32 %v3907_v1  ;;  %v1730_v13 = vadd.f32 %v3888_v48, %v1729_v22  ;;  %v1582_v32 = vand.u32 2147483648, %v3907_v1 }
 0x30d   :  { %v2640_v5 = vpop.eup %2639  ;;  %v1529_v41 = vmul.f32 %v2636_v37, %v1528_v3  ;;  %2647 = vtanh.f32 %v1482_v26  ;;  %v1580_v43 = vand.u32 2147483647, %v3907_v1  ;;  %vm1576_vm3 = vweird.f32 %v3907_v1 }
 0x30e   :  { %v1515_v11 = vadd.f32 %v2634_v46, %v1514_v58  ;;  %v3917_v12 = vadd.f32 1.0, %v2640_v5  ;;  %v3920_v14 = vpop.eup %2641  ;;  %1748 = vst [vmem:[%s4008_s4 + $0x8] sm:$0xff] %v1730_v13  ;;  %v1568_v54 = vor.u32 1.1754944e-38, %v1567_v42  ;;  %v1553_v16 = vor.u32 1.1754944e-38, %v1552_v57 }
 0x30f   :  { %v1530_v15 = vadd.f32 %v2636_v37, %v1529_v41  ;;  %v2644_v17 = vpop.eup %2643  ;;  %v1542_v30 = vmul.f32 %v3920_v14, %v3893_v56  ;;  %vm1581_vm7 = vcmp.eq.f32.partialorder %v1580_v43, 8.507059e+37  ;;  %vm1547_vm8 = vweird.f32 %v3920_v14 }
 0x310   :  { %v1519_v19 = vsel %vm3926_vm12, %v2634_v46, %v1515_v11  ;;  %2649 = vrcp.f32 %v3917_v12  ;;  %v1557_v25 = vmul.f32 %v2644_v17, %v3898_v39  ;;  %vm1562_vm0 = vweird.f32 %v2644_v17  ;;  %vm3977_vm11 = vmor %vm1546_vm10, %vm1547_vm8 }
 0x311   :  { %v1534_v23 = vsel %vm3932_vm13, %v2636_v37, %v1530_v15  ;;  %v1524_v24 = vsel %vm1521_vm14, %v1523_v20, %v1519_v19  ;;  %2651 = vtanh.f32 %v1486_v49  ;;  %v1543_v47 = vsub.f32 1.0, %v1542_v30  ;;  %vm1563_vm4 = vmor %vm1561_vm2, %vm1562_vm0 }
 0x312   :  { %v2646_v27 = vpop.eup %2645  ;;  %v1558_v61 = vsub.f32 1.0, %v1557_v25  ;;  %v1539_v2 = vsel %vm1536_vm15, %v1538_v28, %v1534_v23  ;;  %v1583_v37 = vor.u32 1.1754944e-38, %v1582_v32  ;;  %vm1591_vm12 = vweird.f32 %v3917_v12 }
 0x313   :  { %v1572_v7 = vmul.f32 %v2646_v27, %v3907_v1  ;;  %v1732_v31 = vpop.f32.mrf.mxu0  ;;  %v2648_v35 = vpop.eup %2647  ;;  %v1603_v60 = vmul.f32 %v1539_v2, %v3835_v44  ;;  %vm1577_vm1 = vweird.f32 %v2646_v27  ;;  %v1544_v44 = vmul.f32 %v3920_v14, %v1543_v47 }
 0x314   :  { %v1559_v38 = vmul.f32 %v2644_v17, %v1558_v61  ;;  %v1605_v29 = vmul.f32 %v2648_v35, %v1524_v24  ;;  %v1733_v50 = vadd.f32 %v3888_v48, %v1732_v31  ;;  %vm1578_vm5 = vmor %vm1576_vm3, %vm1577_vm1  ;;  %v1595_v53 = vand.u32 2147483647, %v3917_v12 }
 0x315   :  { %v1573_v36 = vsub.f32 1.0, %v1572_v7  ;;  %v1545_v5 = vadd.f32 %v3920_v14, %v1544_v44  ;;  %vm1551_vm14 = vcmp.eq.f32.partialorder %v1550_v8, 8.507059e+37 }
 0x316   :  { %v3952_v45 = vpop.eup %2649  ;;  %v1560_v6 = vadd.f32 %v2644_v17, %v1559_v38  ;;  %1749 = vst [vmem:[%s4008_s4 + $0x10] sm:$0xff] %v1733_v50  ;;  %v1607_v10 = vadd.f32 %v1605_v29, %v1603_v60  ;;  %vm1596_vm15 = vcmp.eq.f32.partialorder %v1595_v53, 8.507059e+37 }
 0x317   :  { %v1574_v40 = vmul.f32 %v2646_v27, %v1573_v36  ;;  %v1587_v51 = vmul.f32 %v3952_v45, %v3917_v12  ;;  %v2652_v46 = vpop.eup %2651  ;;  %vm1592_vm9 = vweird.f32 %v3952_v45  ;;  %v1549_v11 = vsel %vm3977_vm11, %v3920_v14, %v1545_v5 }
 0x318   :  { %v1564_v4 = vsel %vm1563_vm4, %v2644_v17, %v1560_v6  ;;  %2653 = vtanh.f32 %v1607_v10  ;;  %vm1593_vm13 = vmor %vm1591_vm12, %vm1592_vm9 }
 0x319   :  { %v1588_v52 = vsub.f32 1.0, %v1587_v51  ;;  %v1575_v55 = vadd.f32 %v2646_v27, %v1574_v40  ;;  %v1569_v0 = vsel %vm1566_vm6, %v1568_v54, %v1564_v4 }
 0x31a   :  { %v1606_v1 = vmul.f32 %v2652_v46, %v1569_v0 }
 0x31b   :  { %v1579_v39 = vsel %vm1578_vm5, %v2646_v27, %v1575_v55  ;;  %v1734_v34 = vpop.f32.mrf.mxu0  ;;  %v1589_v59 = vmul.f32 %v3952_v45, %v1588_v52 }
 0x31c   :  { %v1584_v3 = vsel %vm1581_vm7, %v1583_v37, %v1579_v39  ;;  %v1735_v26 = vadd.f32 %v3888_v48, %v1734_v34 }
 0x31d   :  { %v1604_v22 = vmul.f32 %v1584_v3, %v3856_v21  ;;  %v1590_v41 = vadd.f32 %v3952_v45, %v1589_v59  ;;  %v1597_v21 = vand.u32 2147483648, %v3917_v12  ;;  %v1554_v12 = vsel %vm1551_vm14, %v1553_v16, %v1549_v11 }
 0x31e   :  { %1750 = vst [vmem:[%s4008_s4 + $0x18] sm:$0xff] %v1735_v26  ;;  %v2654_v15 = vpop.eup %2653 }
 0x31f   :  { %v1608_v58 = vadd.f32 %v1606_v1, %v1604_v22  ;;  %v1594_v13 = vsel %vm1593_vm13, %v3952_v45, %v1590_v41  ;;  %v1598_v17 = vor.u32 1.1754944e-38, %v1597_v21  ;;  %v1611_v19 = vmul.f32 %v2654_v15, %v1554_v12 }
 0x321   :  { %2655 = vtanh.f32 %v1608_v58  ;;  %v1599_v18 = vsel %vm1596_vm15, %v1598_v17, %v1594_v13 }
 0x323   :  { %v1737_v9 = vpop.f32.mrf.mxu0 }
 0x324   :  { %v1738_v62 = vadd.f32 %v3888_v48, %v1737_v9 }
 0x326   :  { %1751 = vst [vmem:[%s4008_s4 + $0x20] sm:$0xff] %v1738_v62 }
 0x327   :  { %v2656_v56 = vpop.eup %2655 }
 0x328   :  { %v1612_v49 = vmul.f32 %v2656_v56, %v1599_v18 }
 0x32a   :  { %v2525_v20 = vpack.c.bf16 %v1612_v49, %v1611_v19 }
 0x32b   :  { %v1739_v14 = vpop.f32.mrf.mxu0 }
 0x32c   :  { %2526 = vst [vmem:[#allocation2 + $0x8] sm:$0xff] %v2525_v20   ;;  %v1740_v23 = vadd.f32 %v3888_v48, %v1739_v14 }
 0x32e   :  { %1752 = vst [vmem:[%s4008_s4 + $0x28] sm:$0xff] %v1740_v23 }
 0x333   :  { %v2498_v25 = vld [vmem:[#allocation2 + $0x8] sm:$0xff] }
 0x334   :  { %1741 = vmatmul.bf16.gmra.mxu0 %v2498_v25 }
 0x3b1   :  { %v1742_v27 = vpop.f32.mrf.mxu0 }
 0x3b2   :  { %v1743_v28 = vadd.f32 %v3888_v48, %v1742_v27 }
 0x3b4   :  { %1753 = vst [vmem:[%s4008_s4 + $0x30] sm:$0xff] %v1743_v28 }
 0x3b9   :  { %v1744_v30 = vpop.f32.mrf.mxu0 }
 0x3ba   :  { %v1745_v24 = vadd.f32 %v3888_v48, %v1744_v30 }
 0x3bc   :  { %1754 = vst [vmem:[%s4008_s4 + $0x38] sm:$0xff] %v1745_v24 }

</bundles_post_ra>
